<compile_context>
chip_gen: v7x
topology: tpu7x:2x2x1
jax: 0.10.0
libtpu: 0.0.40
codegen_flags: <defaults>
</compile_context>

<pallas_src>
import functools

import jax
import jax.numpy as jnp
from jax import lax
from jax.experimental import pallas as pl
from jax.experimental.pallas import tpu as pltpu


def _round_up(x, m):
    return (x + m - 1) // m * m


def lightgcn_kernel(users_ref, items_ref,            # SMEM int32 [B]
                    graph_ui_ref, graph_iu_ref,      # VMEM bf16  [U_pad,I_pad] / [I_pad,U_pad]
                    e_item_ref,                      # VMEM f32   [I_pad,D_pad]
                    gamma_ref,                       # VMEM f32   [B_pad,1] (output)
                    eu_ref, ei_ref,                  # VMEM bf16  current-layer embeddings
                    acc_u_ref, acc_i_ref,            # VMEM f32   running sums over layers
                    *, n_layers, batch):
    # ---- layer 0 -------------------------------------------------------------
    e_item_f32 = e_item_ref[...]
    e_item_bf = e_item_f32.astype(jnp.bfloat16)
    # embedding_user = Graph_UI @ embedding_item.weight   (bf16 in, f32 acc)
    e_user_f32 = jnp.dot(graph_ui_ref[...], e_item_bf,
                         preferred_element_type=jnp.float32)

    eu_ref[...] = e_user_f32.astype(jnp.bfloat16)
    ei_ref[...] = e_item_bf
    acc_u_ref[...] = e_user_f32          # accumulator initialized directly
    acc_i_ref[...] = e_item_f32

    # ---- propagation: [Eu;Ei] <- [G_ui @ Ei ; G_iu @ Eu] ---------------------
    def layer(_, carry):
        new_u = jnp.dot(graph_ui_ref[...], ei_ref[...],
                        preferred_element_type=jnp.float32)
        new_i = jnp.dot(graph_iu_ref[...], eu_ref[...],
                        preferred_element_type=jnp.float32)
        acc_u_ref[...] += new_u
        acc_i_ref[...] += new_i
        eu_ref[...] = new_u.astype(jnp.bfloat16)
        ei_ref[...] = new_i.astype(jnp.bfloat16)
        return carry

    lax.fori_loop(0, n_layers, layer, 0, unroll=True)

    # ---- fused gather + dot epilogue -----------------------------------------
    # light_out = acc / (n_layers+1); gamma_b = sum(light_u[u_b] * light_i[i_b])
    gamma_ref[...] = jnp.zeros_like(gamma_ref)       # pad rows deterministic
    inv = 1.0 / float(n_layers + 1)
    scale = inv * inv

    def gather_body(b, carry):
        u = users_ref[b]
        it = items_ref[b]
        prod = acc_u_ref[pl.ds(u, 1), :] * acc_i_ref[pl.ds(it, 1), :]
        gamma_ref[pl.ds(b, 1), :] = (
            jnp.sum(prod, axis=1, keepdims=True) * scale)
        return carry

    lax.fori_loop(0, batch, gather_body, 0, unroll=True)


def prepare_lightgcn_graph(graph_ui, e_item):
    """One-time (per model) padding + bf16 cast of the static graph blocks.

    Hoisted out of the forward path so the whole-graph pad/convert is not paid
    on every call. Pads to 128-lane / 128-sublane blocks so bf16 vregs and the
    MXU feed are dense on v5e/v6e/v7x.
    """
    U, I = graph_ui.shape
    D = e_item.shape[1]
    U_pad = _round_up(max(U, 8), 128)
    I_pad = _round_up(max(I, 8), 128)
    D_pad = _round_up(max(D, 128), 128)

    g_ui = jnp.zeros((U_pad, I_pad), jnp.bfloat16
                     ).at[:U, :I].set(graph_ui.astype(jnp.bfloat16))
    g_iu = jnp.zeros((I_pad, U_pad), jnp.bfloat16
                     ).at[:I, :U].set(graph_ui.T.astype(jnp.bfloat16))
    e_it = jnp.zeros((I_pad, D_pad), jnp.float32
                     ).at[:I, :D].set(e_item.astype(jnp.float32))
    return g_ui, g_iu, e_it, (U, I, D)


def _vmem_limit_bytes(needed_bytes):
    """Scoped-VMEM budget with headroom, capped below physical capacity."""
    try:
        cap = int(pltpu.get_tpu_info().vmem_capacity_bytes)
    except Exception:
        cap = 64 << 20                       # conservative (v7x per-TC VMEM)
    want = max(needed_bytes + (4 << 20), 16 << 20)
    return int(min(want, cap - (16 << 20)))


def simple_n2_lightgcn_forward(prepped, users, items, *, n_layers):
    """Forward pass. `prepped` comes from prepare_lightgcn_graph (static)."""
    g_ui, g_iu, e_it, (U, I, D) = prepped
    U_pad, I_pad = g_ui.shape
    D_pad = e_it.shape[1]
    B = int(users.shape[0])
    B_pad = _round_up(B, 8)

    u_idx = users.astype(jnp.int32)
    i_idx = items.astype(jnp.int32)

    kernel = functools.partial(lightgcn_kernel, n_layers=n_layers, batch=B)

    smem = pl.BlockSpec(memory_space=pltpu.MemorySpace.SMEM)
    vmem = pl.BlockSpec(memory_space=pltpu.MemorySpace.VMEM)

    # Gridless call -> single (not double-buffered) copy of each operand.
    vmem_bytes = (2 * U_pad * I_pad * 2            # bf16 graph blocks
                  + I_pad * D_pad * 4              # f32 item embeddings
                  + (U_pad + I_pad) * D_pad * (2 + 4)   # eu/ei bf16 + acc f32
                  + B_pad * 4)                     # gamma
    vmem_limit = _vmem_limit_bytes(vmem_bytes)

    gamma = pl.pallas_call(
        kernel,
        out_shape=jax.ShapeDtypeStruct((B_pad, 1), jnp.float32),
        in_specs=[smem, smem, vmem, vmem, vmem],
        out_specs=vmem,
        scratch_shapes=[
            pltpu.VMEM((U_pad, D_pad), jnp.bfloat16),   # current user emb
            pltpu.VMEM((I_pad, D_pad), jnp.bfloat16),   # current item emb
            pltpu.VMEM((U_pad, D_pad), jnp.float32),    # user accumulator
            pltpu.VMEM((I_pad, D_pad), jnp.float32),    # item accumulator
        ],
        compiler_params=pltpu.CompilerParams(vmem_limit_bytes=vmem_limit),
    )(u_idx, i_idx, g_ui, g_iu, e_it)
    return gamma[:B, 0]


def _reference_forward_f32(graph, graph_ui, e_item, users, items, *, n_layers):
    """Pure-f32 reference mirroring the PyTorch module (full dense graph)."""
    U = graph_ui.shape[0]
    e_user = graph_ui @ e_item
    all_emb = jnp.concatenate([e_user, e_item], axis=0)
    embs = [all_emb]
    for _ in range(n_layers):
        all_emb = graph @ all_emb
        embs.append(all_emb)
    light_out = jnp.mean(jnp.stack(embs, axis=1), axis=1)
    return jnp.sum(light_out[:U][users] * light_out[U:][items], axis=1)


def _reference_forward_bf16(graph_ui, graph_iu, e_item, users, items,
                            *, n_layers):
    """Reference with the kernel's exact bf16-in / f32-accumulate math."""
    g_ui = graph_ui.astype(jnp.bfloat16)
    g_iu = graph_iu.astype(jnp.bfloat16)
    ei_bf = e_item.astype(jnp.bfloat16)
    e_user = jnp.dot(g_ui, ei_bf, preferred_element_type=jnp.float32)
    eu_bf = e_user.astype(jnp.bfloat16)
    acc_u = e_user
    acc_i = e_item.astype(jnp.float32)
    for _ in range(n_layers):
        nu = jnp.dot(g_ui, ei_bf, preferred_element_type=jnp.float32)
        ni = jnp.dot(g_iu, eu_bf, preferred_element_type=jnp.float32)
        acc_u = acc_u + nu
        acc_i = acc_i + ni
        eu_bf = nu.astype(jnp.bfloat16)
        ei_bf = ni.astype(jnp.bfloat16)
    inv = 1.0 / float(n_layers + 1)
    return jnp.sum(acc_u[users] * acc_i[items], axis=1) * (inv * inv)


if __name__ == "__main__":
    # Small, deterministic synthetic "dataset" (no .pt files).
    num_users, num_items, latent_dim = 16, 48, 32
    n_layers = 3
    batch = 8
    N = num_users + num_items

    key = jax.random.PRNGKey(0)
    k_emb, k_adj, k_u, k_i = jax.random.split(key, 4)

    # embedding_item ~ Normal(std=0.1)
    e_item = (0.1 * jax.random.normal(k_emb, (num_items, latent_dim))
              ).astype(jnp.float32)

    # Synthetic bipartite interaction matrix R and symmetric normalization
    # (dense equivalent of dataset.getSparseGraph()).
    R = (jax.random.uniform(k_adj, (num_users, num_items)) < 0.3
         ).astype(jnp.float32)
    A = jnp.zeros((N, N), dtype=jnp.float32)
    A = A.at[:num_users, num_users:].set(R)
    A = A.at[num_users:, :num_users].set(R.T)
    deg = A.sum(axis=1)
    d_inv_sqrt = jnp.where(deg > 0, deg ** -0.5, 0.0)
    graph = d_inv_sqrt[:, None] * A * d_inv_sqrt[None, :]     # [N, N]
    graph_ui = graph[:num_users, num_users:]                  # [U, I]
    graph_iu = graph[num_users:, :num_users]                  # [I, U] (= G_ui^T)

    users = jax.random.randint(k_u, (batch,), 0, num_users, dtype=jnp.int32)
    items = jax.random.randint(k_i, (batch,), 0, num_items, dtype=jnp.int32)

    # One-time (per model) padding / cast of the static graph + item table.
    prepped = prepare_lightgcn_graph(graph_ui, e_item)
    prepped = jax.tree_util.tree_map(
        lambda x: jax.block_until_ready(x) if isinstance(x, jax.Array) else x,
        prepped)

    gamma = simple_n2_lightgcn_forward(prepped, users, items,
                                       n_layers=n_layers)
    gamma = jax.block_until_ready(gamma)
    assert gamma.shape == (batch,)

    ref_bf16 = _reference_forward_bf16(graph_ui, graph_iu, e_item, users,
                                       items, n_layers=n_layers)
    ref_f32 = _reference_forward_f32(graph, graph_ui, e_item, users, items,
                                     n_layers=n_layers)

    # Tight check vs. the precision-matched reference, loose vs. pure f32.
    assert jnp.allclose(gamma, ref_bf16, atol=1e-4, rtol=1e-3), (gamma, ref_bf16)
    assert jnp.allclose(gamma, ref_f32, atol=5e-3, rtol=5e-2), (gamma, ref_f32)
    print("KERNEL_OK")
</pallas_src>

<mosaic_0001>
module attributes {stable_mosaic.version = 11 : i64} {
  func.func @lightgcn_kernel(%arg0: memref<8xi32, #tpu.memory_space<smem>>, %arg1: memref<8xi32, #tpu.memory_space<smem>>, %arg2: memref<128x128xbf16, #tpu.memory_space<vmem>>, %arg3: memref<128x128xbf16, #tpu.memory_space<vmem>>, %arg4: memref<128x128xf32, #tpu.memory_space<vmem>>, %arg5: memref<8x1xf32, #tpu.memory_space<vmem>>, %arg6: memref<128x128xbf16, #tpu.memory_space<vmem>>, %arg7: memref<128x128xbf16, #tpu.memory_space<vmem>>, %arg8: memref<128x128xf32, #tpu.memory_space<vmem>>, %arg9: memref<128x128xf32, #tpu.memory_space<vmem>>) attributes {dimension_semantics = [], scalar_prefetch = 0 : i64, scratch_operands = 4 : i64, tpu.core_type = #tpu.core_type<tc>} {
    %c0 = arith.constant 0 : index
    %c0_0 = arith.constant 0 : index
    %0 = vector.load %arg4[%c0, %c0_0] : memref<128x128xf32, #tpu.memory_space<vmem>>, vector<128x128xf32>
    %1 = arith.truncf %0 : vector<128x128xf32> to vector<128x128xbf16>
    %c0_1 = arith.constant 0 : index
    %c0_2 = arith.constant 0 : index
    %2 = vector.load %arg2[%c0_1, %c0_2] : memref<128x128xbf16, #tpu.memory_space<vmem>>, vector<128x128xbf16>
    %cst = arith.constant dense<0.000000e+00> : vector<128x128xf32>
    %3 = tpu.matmul %2, %1, %cst {dimension_numbers = #tpu.dot_dimension_numbers<[1], [0], [0], [1], [0, 0, 1, 1], [], []>} : vector<128x128xbf16>, vector<128x128xbf16>, vector<128x128xf32> -> vector<128x128xf32>
    %4 = arith.truncf %3 : vector<128x128xf32> to vector<128x128xbf16>
    %c0_3 = arith.constant 0 : index
    %c0_4 = arith.constant 0 : index
    %5 = vector.load %arg6[%c0_3, %c0_4] : memref<128x128xbf16, #tpu.memory_space<vmem>>, vector<128x128xbf16>
    tpu.vector_store %arg6[%c0_3, %c0_4], %4 {strides = array<i32>} : memref<128x128xbf16, #tpu.memory_space<vmem>>, vector<128x128xbf16>,
    %c0_5 = arith.constant 0 : index
    %c0_6 = arith.constant 0 : index
    %6 = vector.load %arg7[%c0_5, %c0_6] : memref<128x128xbf16, #tpu.memory_space<vmem>>, vector<128x128xbf16>
    tpu.vector_store %arg7[%c0_5, %c0_6], %1 {strides = array<i32>} : memref<128x128xbf16, #tpu.memory_space<vmem>>, vector<128x128xbf16>,
    %c0_7 = arith.constant 0 : index
    %c0_8 = arith.constant 0 : index
    %7 = vector.load %arg8[%c0_7, %c0_8] : memref<128x128xf32, #tpu.memory_space<vmem>>, vector<128x128xf32>
    tpu.vector_store %arg8[%c0_7, %c0_8], %3 {strides = array<i32>} : memref<128x128xf32, #tpu.memory_space<vmem>>, vector<128x128xf32>,
    %c0_9 = arith.constant 0 : index
    %c0_10 = arith.constant 0 : index
    %8 = vector.load %arg9[%c0_9, %c0_10] : memref<128x128xf32, #tpu.memory_space<vmem>>, vector<128x128xf32>
    tpu.vector_store %arg9[%c0_9, %c0_10], %0 {strides = array<i32>} : memref<128x128xf32, #tpu.memory_space<vmem>>, vector<128x128xf32>,
    %c0_i32 = arith.constant 0 : i32
    %c0_11 = arith.constant 0 : index
    %c0_12 = arith.constant 0 : index
    %9 = vector.load %arg2[%c0_11, %c0_12] : memref<128x128xbf16, #tpu.memory_space<vmem>>, vector<128x128xbf16>
    %c0_13 = arith.constant 0 : index
    %c0_14 = arith.constant 0 : index
    %10 = vector.load %arg7[%c0_13, %c0_14] : memref<128x128xbf16, #tpu.memory_space<vmem>>, vector<128x128xbf16>
    %cst_15 = arith.constant dense<0.000000e+00> : vector<128x128xf32>
    %11 = tpu.matmul %9, %10, %cst_15 {dimension_numbers = #tpu.dot_dimension_numbers<[1], [0], [0], [1], [0, 0, 1, 1], [], []>} : vector<128x128xbf16>, vector<128x128xbf16>, vector<128x128xf32> -> vector<128x128xf32>
    %c0_16 = arith.constant 0 : index
    %c0_17 = arith.constant 0 : index
    %12 = vector.load %arg3[%c0_16, %c0_17] : memref<128x128xbf16, #tpu.memory_space<vmem>>, vector<128x128xbf16>
    %c0_18 = arith.constant 0 : index
    %c0_19 = arith.constant 0 : index
    %13 = vector.load %arg6[%c0_18, %c0_19] : memref<128x128xbf16, #tpu.memory_space<vmem>>, vector<128x128xbf16>
    %cst_20 = arith.constant dense<0.000000e+00> : vector<128x128xf32>
    %14 = tpu.matmul %12, %13, %cst_20 {dimension_numbers = #tpu.dot_dimension_numbers<[1], [0], [0], [1], [0, 0, 1, 1], [], []>} : vector<128x128xbf16>, vector<128x128xbf16>, vector<128x128xf32> -> vector<128x128xf32>
    %c0_21 = arith.constant 0 : index
    %c0_22 = arith.constant 0 : index
    %15 = vector.load %arg8[%c0_21, %c0_22] : memref<128x128xf32, #tpu.memory_space<vmem>>, vector<128x128xf32>
    %16 = arith.addf %15, %11 : vector<128x128xf32>
    %c0_23 = arith.constant 0 : index
    %c0_24 = arith.constant 0 : index
    %17 = vector.load %arg8[%c0_23, %c0_24] : memref<128x128xf32, #tpu.memory_space<vmem>>, vector<128x128xf32>
    tpu.vector_store %arg8[%c0_23, %c0_24], %16 {strides = array<i32>} : memref<128x128xf32, #tpu.memory_space<vmem>>, vector<128x128xf32>,
    %c0_25 = arith.constant 0 : index
    %c0_26 = arith.constant 0 : index
    %18 = vector.load %arg9[%c0_25, %c0_26] : memref<128x128xf32, #tpu.memory_space<vmem>>, vector<128x128xf32>
    %19 = arith.addf %18, %14 : vector<128x128xf32>
    %c0_27 = arith.constant 0 : index
    %c0_28 = arith.constant 0 : index
    %20 = vector.load %arg9[%c0_27, %c0_28] : memref<128x128xf32, #tpu.memory_space<vmem>>, vector<128x128xf32>
    tpu.vector_store %arg9[%c0_27, %c0_28], %19 {strides = array<i32>} : memref<128x128xf32, #tpu.memory_space<vmem>>, vector<128x128xf32>,
    %21 = arith.truncf %11 : vector<128x128xf32> to vector<128x128xbf16>
    %c0_29 = arith.constant 0 : index
    %c0_30 = arith.constant 0 : index
    %22 = vector.load %arg6[%c0_29, %c0_30] : memref<128x128xbf16, #tpu.memory_space<vmem>>, vector<128x128xbf16>
    tpu.vector_store %arg6[%c0_29, %c0_30], %21 {strides = array<i32>} : memref<128x128xbf16, #tpu.memory_space<vmem>>, vector<128x128xbf16>,
    %23 = arith.truncf %14 : vector<128x128xf32> to vector<128x128xbf16>
    %c0_31 = arith.constant 0 : index
    %c0_32 = arith.constant 0 : index
    %24 = vector.load %arg7[%c0_31, %c0_32] : memref<128x128xbf16, #tpu.memory_space<vmem>>, vector<128x128xbf16>
    tpu.vector_store %arg7[%c0_31, %c0_32], %23 {strides = array<i32>} : memref<128x128xbf16, #tpu.memory_space<vmem>>, vector<128x128xbf16>,
    %c1_i32 = arith.constant 1 : i32
    %c0_33 = arith.constant 0 : index
    %c0_34 = arith.constant 0 : index
    %25 = vector.load %arg2[%c0_33, %c0_34] : memref<128x128xbf16, #tpu.memory_space<vmem>>, vector<128x128xbf16>
    %c0_35 = arith.constant 0 : index
    %c0_36 = arith.constant 0 : index
    %26 = vector.load %arg7[%c0_35, %c0_36] : memref<128x128xbf16, #tpu.memory_space<vmem>>, vector<128x128xbf16>
    %cst_37 = arith.constant dense<0.000000e+00> : vector<128x128xf32>
    %27 = tpu.matmul %25, %26, %cst_37 {dimension_numbers = #tpu.dot_dimension_numbers<[1], [0], [0], [1], [0, 0, 1, 1], [], []>} : vector<128x128xbf16>, vector<128x128xbf16>, vector<128x128xf32> -> vector<128x128xf32>
    %c0_38 = arith.constant 0 : index
    %c0_39 = arith.constant 0 : index
    %28 = vector.load %arg3[%c0_38, %c0_39] : memref<128x128xbf16, #tpu.memory_space<vmem>>, vector<128x128xbf16>
    %c0_40 = arith.constant 0 : index
    %c0_41 = arith.constant 0 : index
    %29 = vector.load %arg6[%c0_40, %c0_41] : memref<128x128xbf16, #tpu.memory_space<vmem>>, vector<128x128xbf16>
    %cst_42 = arith.constant dense<0.000000e+00> : vector<128x128xf32>
    %30 = tpu.matmul %28, %29, %cst_42 {dimension_numbers = #tpu.dot_dimension_numbers<[1], [0], [0], [1], [0, 0, 1, 1], [], []>} : vector<128x128xbf16>, vector<128x128xbf16>, vector<128x128xf32> -> vector<128x128xf32>
    %c0_43 = arith.constant 0 : index
    %c0_44 = arith.constant 0 : index
    %31 = vector.load %arg8[%c0_43, %c0_44] : memref<128x128xf32, #tpu.memory_space<vmem>>, vector<128x128xf32>
    %32 = arith.addf %31, %27 : vector<128x128xf32>
    %c0_45 = arith.constant 0 : index
    %c0_46 = arith.constant 0 : index
    %33 = vector.load %arg8[%c0_45, %c0_46] : memref<128x128xf32, #tpu.memory_space<vmem>>, vector<128x128xf32>
    tpu.vector_store %arg8[%c0_45, %c0_46], %32 {strides = array<i32>} : memref<128x128xf32, #tpu.memory_space<vmem>>, vector<128x128xf32>,
    %c0_47 = arith.constant 0 : index
    %c0_48 = arith.constant 0 : index
    %34 = vector.load %arg9[%c0_47, %c0_48] : memref<128x128xf32, #tpu.memory_space<vmem>>, vector<128x128xf32>
    %35 = arith.addf %34, %30 : vector<128x128xf32>
    %c0_49 = arith.constant 0 : index
    %c0_50 = arith.constant 0 : index
    %36 = vector.load %arg9[%c0_49, %c0_50] : memref<128x128xf32, #tpu.memory_space<vmem>>, vector<128x128xf32>
    tpu.vector_store %arg9[%c0_49, %c0_50], %35 {strides = array<i32>} : memref<128x128xf32, #tpu.memory_space<vmem>>, vector<128x128xf32>,
    %37 = arith.truncf %27 : vector<128x128xf32> to vector<128x128xbf16>
    %c0_51 = arith.constant 0 : index
    %c0_52 = arith.constant 0 : index
    %38 = vector.load %arg6[%c0_51, %c0_52] : memref<128x128xbf16, #tpu.memory_space<vmem>>, vector<128x128xbf16>
    tpu.vector_store %arg6[%c0_51, %c0_52], %37 {strides = array<i32>} : memref<128x128xbf16, #tpu.memory_space<vmem>>, vector<128x128xbf16>,
    %39 = arith.truncf %30 : vector<128x128xf32> to vector<128x128xbf16>
    %c0_53 = arith.constant 0 : index
    %c0_54 = arith.constant 0 : index
    %40 = vector.load %arg7[%c0_53, %c0_54] : memref<128x128xbf16, #tpu.memory_space<vmem>>, vector<128x128xbf16>
    tpu.vector_store %arg7[%c0_53, %c0_54], %39 {strides = array<i32>} : memref<128x128xbf16, #tpu.memory_space<vmem>>, vector<128x128xbf16>,
    %c2_i32 = arith.constant 2 : i32
    %c0_55 = arith.constant 0 : index
    %c0_56 = arith.constant 0 : index
    %41 = vector.load %arg2[%c0_55, %c0_56] : memref<128x128xbf16, #tpu.memory_space<vmem>>, vector<128x128xbf16>
    %c0_57 = arith.constant 0 : index
    %c0_58 = arith.constant 0 : index
    %42 = vector.load %arg7[%c0_57, %c0_58] : memref<128x128xbf16, #tpu.memory_space<vmem>>, vector<128x128xbf16>
    %cst_59 = arith.constant dense<0.000000e+00> : vector<128x128xf32>
    %43 = tpu.matmul %41, %42, %cst_59 {dimension_numbers = #tpu.dot_dimension_numbers<[1], [0], [0], [1], [0, 0, 1, 1], [], []>} : vector<128x128xbf16>, vector<128x128xbf16>, vector<128x128xf32> -> vector<128x128xf32>
    %c0_60 = arith.constant 0 : index
    %c0_61 = arith.constant 0 : index
    %44 = vector.load %arg3[%c0_60, %c0_61] : memref<128x128xbf16, #tpu.memory_space<vmem>>, vector<128x128xbf16>
    %c0_62 = arith.constant 0 : index
    %c0_63 = arith.constant 0 : index
    %45 = vector.load %arg6[%c0_62, %c0_63] : memref<128x128xbf16, #tpu.memory_space<vmem>>, vector<128x128xbf16>
    %cst_64 = arith.constant dense<0.000000e+00> : vector<128x128xf32>
    %46 = tpu.matmul %44, %45, %cst_64 {dimension_numbers = #tpu.dot_dimension_numbers<[1], [0], [0], [1], [0, 0, 1, 1], [], []>} : vector<128x128xbf16>, vector<128x128xbf16>, vector<128x128xf32> -> vector<128x128xf32>
    %c0_65 = arith.constant 0 : index
    %c0_66 = arith.constant 0 : index
    %47 = vector.load %arg8[%c0_65, %c0_66] : memref<128x128xf32, #tpu.memory_space<vmem>>, vector<128x128xf32>
    %48 = arith.addf %47, %43 : vector<128x128xf32>
    %c0_67 = arith.constant 0 : index
    %c0_68 = arith.constant 0 : index
    %49 = vector.load %arg8[%c0_67, %c0_68] : memref<128x128xf32, #tpu.memory_space<vmem>>, vector<128x128xf32>
    tpu.vector_store %arg8[%c0_67, %c0_68], %48 {strides = array<i32>} : memref<128x128xf32, #tpu.memory_space<vmem>>, vector<128x128xf32>,
    %c0_69 = arith.constant 0 : index
    %c0_70 = arith.constant 0 : index
    %50 = vector.load %arg9[%c0_69, %c0_70] : memref<128x128xf32, #tpu.memory_space<vmem>>, vector<128x128xf32>
    %51 = arith.addf %50, %46 : vector<128x128xf32>
    %c0_71 = arith.constant 0 : index
    %c0_72 = arith.constant 0 : index
    %52 = vector.load %arg9[%c0_71, %c0_72] : memref<128x128xf32, #tpu.memory_space<vmem>>, vector<128x128xf32>
    tpu.vector_store %arg9[%c0_71, %c0_72], %51 {strides = array<i32>} : memref<128x128xf32, #tpu.memory_space<vmem>>, vector<128x128xf32>,
    %53 = arith.truncf %43 : vector<128x128xf32> to vector<128x128xbf16>
    %c0_73 = arith.constant 0 : index
    %c0_74 = arith.constant 0 : index
    %54 = vector.load %arg6[%c0_73, %c0_74] : memref<128x128xbf16, #tpu.memory_space<vmem>>, vector<128x128xbf16>
    tpu.vector_store %arg6[%c0_73, %c0_74], %53 {strides = array<i32>} : memref<128x128xbf16, #tpu.memory_space<vmem>>, vector<128x128xbf16>,
    %55 = arith.truncf %46 : vector<128x128xf32> to vector<128x128xbf16>
    %c0_75 = arith.constant 0 : index
    %c0_76 = arith.constant 0 : index
    %56 = vector.load %arg7[%c0_75, %c0_76] : memref<128x128xbf16, #tpu.memory_space<vmem>>, vector<128x128xbf16>
    tpu.vector_store %arg7[%c0_75, %c0_76], %55 {strides = array<i32>} : memref<128x128xbf16, #tpu.memory_space<vmem>>, vector<128x128xbf16>,
    %cst_77 = arith.constant 0.000000e+00 : f32
    %57 = vector.broadcast %cst_77 : f32 to vector<8x1xf32>
    %c0_78 = arith.constant 0 : index
    %c0_79 = arith.constant 0 : index
    %58 = vector.load %arg5[%c0_78, %c0_79] : memref<8x1xf32, #tpu.memory_space<vmem>>, vector<8x1xf32>
    tpu.vector_store %arg5[%c0_78, %c0_79], %57 {strides = array<i32>} : memref<8x1xf32, #tpu.memory_space<vmem>>, vector<8x1xf32>,
    %c0_i32_80 = arith.constant 0 : i32
    %59 = arith.index_cast %c0_i32_80 : i32 to index
    %60 = memref.load %arg0[%59] : memref<8xi32, #tpu.memory_space<smem>>
    %61 = arith.index_cast %c0_i32_80 : i32 to index
    %62 = memref.load %arg1[%61] : memref<8xi32, #tpu.memory_space<smem>>
    %63 = arith.index_cast %60 : i32 to index
    %c0_81 = arith.constant 0 : index
    %64 = vector.load %arg8[%63, %c0_81] : memref<128x128xf32, #tpu.memory_space<vmem>>, vector<1x128xf32>
    %65 = arith.index_cast %62 : i32 to index
    %c0_82 = arith.constant 0 : index
    %66 = vector.load %arg9[%65, %c0_82] : memref<128x128xf32, #tpu.memory_space<vmem>>, vector<1x128xf32>
    %67 = arith.mulf %64, %66 : vector<1x128xf32>
    %cst_83 = arith.constant dense<0.000000e+00> : vector<1xf32>
    %68 = vector.multi_reduction <add>, %67, %cst_83 [1] : vector<1x128xf32> to vector<1xf32>
    %69 = vector.shape_cast %68 : vector<1xf32> to vector<1x1xf32>
    %cst_84 = arith.constant 6.250000e-02 : f32
    %70 = vector.broadcast %cst_84 : f32 to vector<1x1xf32>
    %71 = arith.mulf %69, %70 : vector<1x1xf32>
    %72 = arith.index_cast %c0_i32_80 : i32 to index
    %c0_85 = arith.constant 0 : index
    %73 = vector.load %arg5[%72, %c0_85] : memref<8x1xf32, #tpu.memory_space<vmem>>, vector<1x1xf32>
    tpu.vector_store %arg5[%72, %c0_85], %71 {strides = array<i32>} : memref<8x1xf32, #tpu.memory_space<vmem>>, vector<1x1xf32>,
    %c1_i32_86 = arith.constant 1 : i32
    %74 = arith.index_cast %c1_i32_86 : i32 to index
    %75 = memref.load %arg0[%74] : memref<8xi32, #tpu.memory_space<smem>>
    %76 = arith.index_cast %c1_i32_86 : i32 to index
    %77 = memref.load %arg1[%76] : memref<8xi32, #tpu.memory_space<smem>>
    %78 = arith.index_cast %75 : i32 to index
    %c0_87 = arith.constant 0 : index
    %79 = vector.load %arg8[%78, %c0_87] : memref<128x128xf32, #tpu.memory_space<vmem>>, vector<1x128xf32>
    %80 = arith.index_cast %77 : i32 to index
    %c0_88 = arith.constant 0 : index
    %81 = vector.load %arg9[%80, %c0_88] : memref<128x128xf32, #tpu.memory_space<vmem>>, vector<1x128xf32>
    %82 = arith.mulf %79, %81 : vector<1x128xf32>
    %cst_89 = arith.constant dense<0.000000e+00> : vector<1xf32>
    %83 = vector.multi_reduction <add>, %82, %cst_89 [1] : vector<1x128xf32> to vector<1xf32>
    %84 = vector.shape_cast %83 : vector<1xf32> to vector<1x1xf32>
    %cst_90 = arith.constant 6.250000e-02 : f32
    %85 = vector.broadcast %cst_90 : f32 to vector<1x1xf32>
    %86 = arith.mulf %84, %85 : vector<1x1xf32>
    %87 = arith.index_cast %c1_i32_86 : i32 to index
    %c0_91 = arith.constant 0 : index
    %88 = vector.load %arg5[%87, %c0_91] : memref<8x1xf32, #tpu.memory_space<vmem>>, vector<1x1xf32>
    tpu.vector_store %arg5[%87, %c0_91], %86 {strides = array<i32>} : memref<8x1xf32, #tpu.memory_space<vmem>>, vector<1x1xf32>,
    %c2_i32_92 = arith.constant 2 : i32
    %89 = arith.index_cast %c2_i32_92 : i32 to index
    %90 = memref.load %arg0[%89] : memref<8xi32, #tpu.memory_space<smem>>
    %91 = arith.index_cast %c2_i32_92 : i32 to index
    %92 = memref.load %arg1[%91] : memref<8xi32, #tpu.memory_space<smem>>
    %93 = arith.index_cast %90 : i32 to index
    %c0_93 = arith.constant 0 : index
    %94 = vector.load %arg8[%93, %c0_93] : memref<128x128xf32, #tpu.memory_space<vmem>>, vector<1x128xf32>
    %95 = arith.index_cast %92 : i32 to index
    %c0_94 = arith.constant 0 : index
    %96 = vector.load %arg9[%95, %c0_94] : memref<128x128xf32, #tpu.memory_space<vmem>>, vector<1x128xf32>
    %97 = arith.mulf %94, %96 : vector<1x128xf32>
    %cst_95 = arith.constant dense<0.000000e+00> : vector<1xf32>
    %98 = vector.multi_reduction <add>, %97, %cst_95 [1] : vector<1x128xf32> to vector<1xf32>
    %99 = vector.shape_cast %98 : vector<1xf32> to vector<1x1xf32>
    %cst_96 = arith.constant 6.250000e-02 : f32
    %100 = vector.broadcast %cst_96 : f32 to vector<1x1xf32>
    %101 = arith.mulf %99, %100 : vector<1x1xf32>
    %102 = arith.index_cast %c2_i32_92 : i32 to index
    %c0_97 = arith.constant 0 : index
    %103 = vector.load %arg5[%102, %c0_97] : memref<8x1xf32, #tpu.memory_space<vmem>>, vector<1x1xf32>
    tpu.vector_store %arg5[%102, %c0_97], %101 {strides = array<i32>} : memref<8x1xf32, #tpu.memory_space<vmem>>, vector<1x1xf32>,
    %c3_i32 = arith.constant 3 : i32
    %104 = arith.index_cast %c3_i32 : i32 to index
    %105 = memref.load %arg0[%104] : memref<8xi32, #tpu.memory_space<smem>>
    %106 = arith.index_cast %c3_i32 : i32 to index
    %107 = memref.load %arg1[%106] : memref<8xi32, #tpu.memory_space<smem>>
    %108 = arith.index_cast %105 : i32 to index
    %c0_98 = arith.constant 0 : index
    %109 = vector.load %arg8[%108, %c0_98] : memref<128x128xf32, #tpu.memory_space<vmem>>, vector<1x128xf32>
    %110 = arith.index_cast %107 : i32 to index
    %c0_99 = arith.constant 0 : index
    %111 = vector.load %arg9[%110, %c0_99] : memref<128x128xf32, #tpu.memory_space<vmem>>, vector<1x128xf32>
    %112 = arith.mulf %109, %111 : vector<1x128xf32>
    %cst_100 = arith.constant dense<0.000000e+00> : vector<1xf32>
    %113 = vector.multi_reduction <add>, %112, %cst_100 [1] : vector<1x128xf32> to vector<1xf32>
    %114 = vector.shape_cast %113 : vector<1xf32> to vector<1x1xf32>
    %cst_101 = arith.constant 6.250000e-02 : f32
    %115 = vector.broadcast %cst_101 : f32 to vector<1x1xf32>
    %116 = arith.mulf %114, %115 : vector<1x1xf32>
    %117 = arith.index_cast %c3_i32 : i32 to index
    %c0_102 = arith.constant 0 : index
    %118 = vector.load %arg5[%117, %c0_102] : memref<8x1xf32, #tpu.memory_space<vmem>>, vector<1x1xf32>
    tpu.vector_store %arg5[%117, %c0_102], %116 {strides = array<i32>} : memref<8x1xf32, #tpu.memory_space<vmem>>, vector<1x1xf32>,
    %c4_i32 = arith.constant 4 : i32
    %119 = arith.index_cast %c4_i32 : i32 to index
    %120 = memref.load %arg0[%119] : memref<8xi32, #tpu.memory_space<smem>>
    %121 = arith.index_cast %c4_i32 : i32 to index
    %122 = memref.load %arg1[%121] : memref<8xi32, #tpu.memory_space<smem>>
    %123 = arith.index_cast %120 : i32 to index
    %c0_103 = arith.constant 0 : index
    %124 = vector.load %arg8[%123, %c0_103] : memref<128x128xf32, #tpu.memory_space<vmem>>, vector<1x128xf32>
    %125 = arith.index_cast %122 : i32 to index
    %c0_104 = arith.constant 0 : index
    %126 = vector.load %arg9[%125, %c0_104] : memref<128x128xf32, #tpu.memory_space<vmem>>, vector<1x128xf32>
    %127 = arith.mulf %124, %126 : vector<1x128xf32>
    %cst_105 = arith.constant dense<0.000000e+00> : vector<1xf32>
    %128 = vector.multi_reduction <add>, %127, %cst_105 [1] : vector<1x128xf32> to vector<1xf32>
    %129 = vector.shape_cast %128 : vector<1xf32> to vector<1x1xf32>
    %cst_106 = arith.constant 6.250000e-02 : f32
    %130 = vector.broadcast %cst_106 : f32 to vector<1x1xf32>
    %131 = arith.mulf %129, %130 : vector<1x1xf32>
    %132 = arith.index_cast %c4_i32 : i32 to index
    %c0_107 = arith.constant 0 : index
    %133 = vector.load %arg5[%132, %c0_107] : memref<8x1xf32, #tpu.memory_space<vmem>>, vector<1x1xf32>
    tpu.vector_store %arg5[%132, %c0_107], %131 {strides = array<i32>} : memref<8x1xf32, #tpu.memory_space<vmem>>, vector<1x1xf32>,
    %c5_i32 = arith.constant 5 : i32
    %134 = arith.index_cast %c5_i32 : i32 to index
    %135 = memref.load %arg0[%134] : memref<8xi32, #tpu.memory_space<smem>>
    %136 = arith.index_cast %c5_i32 : i32 to index
    %137 = memref.load %arg1[%136] : memref<8xi32, #tpu.memory_space<smem>>
    %138 = arith.index_cast %135 : i32 to index
    %c0_108 = arith.constant 0 : index
    %139 = vector.load %arg8[%138, %c0_108] : memref<128x128xf32, #tpu.memory_space<vmem>>, vector<1x128xf32>
    %140 = arith.index_cast %137 : i32 to index
    %c0_109 = arith.constant 0 : index
    %141 = vector.load %arg9[%140, %c0_109] : memref<128x128xf32, #tpu.memory_space<vmem>>, vector<1x128xf32>
    %142 = arith.mulf %139, %141 : vector<1x128xf32>
    %cst_110 = arith.constant dense<0.000000e+00> : vector<1xf32>
    %143 = vector.multi_reduction <add>, %142, %cst_110 [1] : vector<1x128xf32> to vector<1xf32>
    %144 = vector.shape_cast %143 : vector<1xf32> to vector<1x1xf32>
    %cst_111 = arith.constant 6.250000e-02 : f32
    %145 = vector.broadcast %cst_111 : f32 to vector<1x1xf32>
    %146 = arith.mulf %144, %145 : vector<1x1xf32>
    %147 = arith.index_cast %c5_i32 : i32 to index
    %c0_112 = arith.constant 0 : index
    %148 = vector.load %arg5[%147, %c0_112] : memref<8x1xf32, #tpu.memory_space<vmem>>, vector<1x1xf32>
    tpu.vector_store %arg5[%147, %c0_112], %146 {strides = array<i32>} : memref<8x1xf32, #tpu.memory_space<vmem>>, vector<1x1xf32>,
    %c6_i32 = arith.constant 6 : i32
    %149 = arith.index_cast %c6_i32 : i32 to index
    %150 = memref.load %arg0[%149] : memref<8xi32, #tpu.memory_space<smem>>
    %151 = arith.index_cast %c6_i32 : i32 to index
    %152 = memref.load %arg1[%151] : memref<8xi32, #tpu.memory_space<smem>>
    %153 = arith.index_cast %150 : i32 to index
    %c0_113 = arith.constant 0 : index
    %154 = vector.load %arg8[%153, %c0_113] : memref<128x128xf32, #tpu.memory_space<vmem>>, vector<1x128xf32>
    %155 = arith.index_cast %152 : i32 to index
    %c0_114 = arith.constant 0 : index
    %156 = vector.load %arg9[%155, %c0_114] : memref<128x128xf32, #tpu.memory_space<vmem>>, vector<1x128xf32>
    %157 = arith.mulf %154, %156 : vector<1x128xf32>
    %cst_115 = arith.constant dense<0.000000e+00> : vector<1xf32>
    %158 = vector.multi_reduction <add>, %157, %cst_115 [1] : vector<1x128xf32> to vector<1xf32>
    %159 = vector.shape_cast %158 : vector<1xf32> to vector<1x1xf32>
    %cst_116 = arith.constant 6.250000e-02 : f32
    %160 = vector.broadcast %cst_116 : f32 to vector<1x1xf32>
    %161 = arith.mulf %159, %160 : vector<1x1xf32>
    %162 = arith.index_cast %c6_i32 : i32 to index
    %c0_117 = arith.constant 0 : index
    %163 = vector.load %arg5[%162, %c0_117] : memref<8x1xf32, #tpu.memory_space<vmem>>, vector<1x1xf32>
    tpu.vector_store %arg5[%162, %c0_117], %161 {strides = array<i32>} : memref<8x1xf32, #tpu.memory_space<vmem>>, vector<1x1xf32>,
    %c7_i32 = arith.constant 7 : i32
    %164 = arith.index_cast %c7_i32 : i32 to index
    %165 = memref.load %arg0[%164] : memref<8xi32, #tpu.memory_space<smem>>
    %166 = arith.index_cast %c7_i32 : i32 to index
    %167 = memref.load %arg1[%166] : memref<8xi32, #tpu.memory_space<smem>>
    %168 = arith.index_cast %165 : i32 to index
    %c0_118 = arith.constant 0 : index
    %169 = vector.load %arg8[%168, %c0_118] : memref<128x128xf32, #tpu.memory_space<vmem>>, vector<1x128xf32>
    %170 = arith.index_cast %167 : i32 to index
    %c0_119 = arith.constant 0 : index
    %171 = vector.load %arg9[%170, %c0_119] : memref<128x128xf32, #tpu.memory_space<vmem>>, vector<1x128xf32>
    %172 = arith.mulf %169, %171 : vector<1x128xf32>
    %cst_120 = arith.constant dense<0.000000e+00> : vector<1xf32>
    %173 = vector.multi_reduction <add>, %172, %cst_120 [1] : vector<1x128xf32> to vector<1xf32>
    %174 = vector.shape_cast %173 : vector<1xf32> to vector<1x1xf32>
    %cst_121 = arith.constant 6.250000e-02 : f32
    %175 = vector.broadcast %cst_121 : f32 to vector<1x1xf32>
    %176 = arith.mulf %174, %175 : vector<1x1xf32>
    %177 = arith.index_cast %c7_i32 : i32 to index
    %c0_122 = arith.constant 0 : index
    %178 = vector.load %arg5[%177, %c0_122] : memref<8x1xf32, #tpu.memory_space<vmem>>, vector<1x1xf32>
    tpu.vector_store %arg5[%177, %c0_122], %176 {strides = array<i32>} : memref<8x1xf32, #tpu.memory_space<vmem>>, vector<1x1xf32>,
    %c8_i32 = arith.constant 8 : i32
    return
  }
}

</mosaic_0001>

<bundles_post_ra>
// kernel: tpu_custom_call.1
= control target key start
LH: loop header
LB: loop body
LE: loop exit
PB: predicated region body
PF: predicated region fallthrough
CT: control target
= control target key end

     0   :  { %10 = vsyncpa [#allocation8], 0  ;;  %s2875_s0 = inlined_call_operand.hbm [shape: s32[8], index: 0, kind: input, shape index: {}]   ;;  %s2876_s1 = inlined_call_operand.vmem [shape: s32[8], index: 1, kind: input, shape index: {}]   ;;  %s2877_s2 = inlined_call_operand.hbm [shape: bf16[128,128], index: 2, kind: input, shape index: {}]   ;;  %s2878_s3 = inlined_call_operand.hbm [shape: bf16[128,128], index: 3, kind: input, shape index: {}]   ;;  %s2879_s4 = inlined_call_operand.hbm [shape: f32[128,128], index: 4, kind: input, shape index: {}]   ;;  %s2880_s5 = inlined_call_operand.vmem [shape: f32[8,1], index: 5, kind: output, shape index: {}]  }
   0x1   :  { %11 = vsyncpa [#allocation9], 0 }
   0x2   :  { %12 = vsyncpa [#allocation7], 0 }
   0x3   :  { %13 = vsyncpa [#allocation13], 0  ;;  %s2432_s18 = smov [#allocation12]   ;;  %s28_s22 = sshll.u32 %s2876_s1, 4  ;;  %s2475_s22 = int_to_ptr.vmem [resolvable:$true] %s28_s22 }
   0x4   :  { %s49_s19 = sshll.u32 %s2432_s18, 4  ;;  %s2336_s25 = scalar_lea.hbm %s2878_s3, 1024  ;;  %s50_s19 = int_to_ptr.vmem [resolvable:$true] %s49_s19 }
   0x5   :  { %p2337_p0 = scmp.ne.s32.totalorder %s2878_s3, %s2336_s25  ;;  %p2340_p1 = scmp.lt.u32.totalorder %s2336_s25, %s2878_s3 }
   0x7   :  { %p2342_p2 = pnand %p2340_p1, %p2337_p0 }
   0x9   :  { %2345 = shalt.err (!%p2342_p2)
}
   0xa   :  { %s2346_s30 = scalar_lea.vmem %s50_s19, 1024  ;;  %p2351_p4 = scmp.lt.s32.totalorder %s50_s19, %s50_s19 }
   0xb   :  { %p2347_p3 = scmp.ne.s32.totalorder %s50_s19, %s2346_s30  ;;  %p2352_p5 = scmp.lt.s32.totalorder %s2346_s30, %s2346_s30 }
   0xd   :  { %p2353_p6 = por %p2352_p5, %p2351_p4 }
   0xf   :  { %p2354_p7 = pnand %p2353_p6, %p2347_p3 }
  0x11   :  { %2357 = shalt.err (!%p2354_p7)
}
  0x12   :  { %s2433_s1 = smov 64   ;;  %s2434_s6 = smov 4  }
  0x13   :  { %55 = dma.hbm_to_vmem [thread:$0]  %s2878_s3, 1024, %s50_s19, [#allocation13], %s2433_s1, %s2433_s1, %s2434_s6  }
  0x14   :  { %s2358_s11 = scalar_lea.hbm %s2875_s0, 16 }
  0x15   :  { %p2359_p8 = scmp.ne.s32.totalorder %s2875_s0, %s2358_s11  ;;  %p2362_p9 = scmp.lt.u32.totalorder %s2358_s11, %s2875_s0 }
  0x17   :  { %p2364_p10 = pnand %p2362_p9, %p2359_p8 }
  0x19   :  { %2367 = shalt.err (!%p2364_p10)
}
  0x1a   :  { %s2435_s16 = smov [#allocation6]   ;;  %s2368_s3 = scalar_lea.vmem %s2475_s22, 16 }
  0x1b   :  { %21 = dma.hbm_to_smem %s2875_s0, 16, %s2435_s16, [#allocation8]  }
  0x1c   :  { %p2369_p11 = scmp.ne.s32.totalorder %s2475_s22, %s2368_s3  ;;  %p2373_p12 = scmp.lt.s32.totalorder %s2475_s22, %s2475_s22 }
  0x1d   :  { %p2374_p13 = scmp.lt.s32.totalorder %s2368_s3, %s2368_s3 }
  0x1f   :  { %p2375_p0 = por %p2374_p13, %p2373_p12 }
  0x21   :  { %p2376_p1 = pnand %p2375_p0, %p2369_p11 }
  0x23   :  { %2379 = shalt.err (!%p2376_p1)
}
  0x24   :  { %s2436_s19 = smov [#allocation10]   ;;  %s2437_s20 = smov [#allocation11]  }
  0x25   :  { %31 = dma.vmem_to_smem %s2475_s22, 16, %s2436_s19, [#allocation9]  }
  0x26   :  { %s37_s21 = sshll.u32 %s2437_s20, 4  ;;  %s2438_s23 = smov [#allocation14]   ;;  %s38_s21 = int_to_ptr.vmem [resolvable:$true] %s37_s21 }
  0x27   :  { %s61_s24 = sshll.u32 %s2438_s23, 4  ;;  %s2380_s0 = scalar_lea.hbm %s2877_s2, 1024  ;;  %s62_s24 = int_to_ptr.vmem [resolvable:$true] %s61_s24 }
  0x28   :  { %p2381_p2 = scmp.ne.s32.totalorder %s2877_s2, %s2380_s0  ;;  %p2384_p3 = scmp.lt.u32.totalorder %s2380_s0, %s2877_s2 }
  0x2a   :  { %p2386_p4 = pnand %p2384_p3, %p2381_p2 }
  0x2c   :  { %2389 = shalt.err (!%p2386_p4)
}
  0x2d   :  { %s2390_s22 = scalar_lea.vmem %s38_s21, 1024  ;;  %p2395_p6 = scmp.lt.s32.totalorder %s38_s21, %s38_s21 }
  0x2e   :  { %p2391_p5 = scmp.ne.s32.totalorder %s38_s21, %s2390_s22  ;;  %p2396_p7 = scmp.lt.s32.totalorder %s2390_s22, %s2390_s22 }
  0x30   :  { %p2397_p8 = por %p2396_p7, %p2395_p6 }
  0x32   :  { %p2398_p9 = pnand %p2397_p8, %p2391_p5 }
  0x34   :  { %2401 = shalt.err (!%p2398_p9)
}
  0x35   :  { %43 = dma.hbm_to_vmem [thread:$0]  %s2877_s2, 1024, %s38_s21, [#allocation7], %s2433_s1, %s2433_s1, %s2434_s6  }
  0x36   :  { %s2402_s11 = scalar_lea.hbm %s2879_s4, 2048 }
  0x37   :  { %p2403_p10 = scmp.ne.s32.totalorder %s2879_s4, %s2402_s11  ;;  %p2406_p11 = scmp.lt.u32.totalorder %s2402_s11, %s2879_s4 }
  0x39   :  { %p2408_p12 = pnand %p2406_p11, %p2403_p10 }
  0x3b   :  { %2411 = shalt.err (!%p2408_p12)
}
  0x3c   :  { %s2412_s16 = scalar_lea.vmem %s62_s24, 2048  ;;  %p2417_p0 = scmp.lt.s32.totalorder %s62_s24, %s62_s24 }
  0x3d   :  { %p2413_p13 = scmp.ne.s32.totalorder %s62_s24, %s2412_s16  ;;  %p2418_p1 = scmp.lt.s32.totalorder %s2412_s16, %s2412_s16 }
  0x3f   :  { %p2419_p2 = por %p2418_p1, %p2417_p0 }
  0x41   :  { %p2420_p3 = pnand %p2419_p2, %p2413_p13 }
  0x43   :  { %2423 = shalt.err (!%p2420_p3)
}
  0x44   :  { %s2439_s2 = smov 128   ;;  %s2440_s1 = smov 8  }
  0x45   :  { %67 = dma.hbm_to_vmem [thread:$0]  %s2879_s4, 2048, %s62_s24, [#allocation13], %s2439_s2, %s2439_s2, %s2440_s1  }
  0x46   :  { %2424 = dma.done.wait [#allocation8], 16  }
  0x47   :  { %2425 = vsyncadd [#allocation8], 4294967280 }
  0x48   :  { %2426 = dma.done.wait [#allocation9], 16  }
  0x49   :  { %2427 = vsyncadd [#allocation9], 4294967280 }
  0x4a   :  { %2428 = dma.done.wait [#allocation7], 1024  }
  0x4b   :  { %2429 = vsyncadd [#allocation7], 4294966272 }
  0x4c   :  { %2430 = dma.done.wait [#allocation13], 3072  }
  0x4d   :  { %2431 = vsyncadd [#allocation13], 4294964224 }
  0x4e   :  { %83 = sfence }
  0x4f   :  { %v2536_v0 = vld [vmem:[#allocation14] sm:$0xff]  ;;  %v2538_v1 = vld [vmem:[#allocation14 + $0x8] sm:$0xff]  ;;  %v2540_v2 = vld [vmem:[#allocation14 + $0x10] sm:$0xff]  ;;  %vm1724_vm0 = vcmask 7168   ;;  %s2779_s3 = sld [smem:[#allocation6 + $0x2]]  ;;  %s2781_s19 = sld [smem:[#allocation6]] }
  0x50   :  { %v101_v3 = vpack.c.bf16 %v2538_v1, %v2536_v0  ;;  %v2544_v4 = vld [vmem:[#allocation14 + $0x18] sm:$0xff]  ;;  %v2548_v6 = vld [vmem:[#allocation14 + $0x20] sm:$0xff]  ;;  %v2550_v7 = vld [vmem:[#allocation14 + $0x28] sm:$0xff]  ;;  %s2785_s20 = sld [smem:[#allocation10 + $0x2]]  ;;  %s2789_s21 = sld [smem:[#allocation10]]  ;;  %vm1733_vm1 = vcmask 1040384  }
  0x51   :  { %v102_v5 = vpack.c.bf16 %v2544_v4, %v2540_v2  ;;  %v2552_v8 = vld [vmem:[#allocation14 + $0x30] sm:$0xff]  ;;  %v103_v9 = vpack.c.bf16 %v2550_v7, %v2548_v6  ;;  %v2556_v10 = vld [vmem:[#allocation14 + $0x38] sm:$0xff]  ;;  %v2280_v11 = vld [vmem:[#allocation11] sm:$0xff]   ;;  %s2791_s23 = sld [smem:[#allocation10 + $0x3]]  ;;  %s2797_s25 = sld [smem:[#allocation10 + $0x1]]  ;;  %vm1738_vm2 = vcmask 0  }
  0x52   :  { %2030 = vmatprep.subr.bf16.mxu0 %v101_v3  ;;  %2062 = vmatprep.subr.bf16.mxu1 %v101_v3  ;;  %v2558_v12 = vld [vmem:[#allocation14 + $0x40] sm:$0xff]  ;;  %v104_v13 = vpack.c.bf16 %v2556_v10, %v2552_v8  ;;  %v2562_v15 = vld [vmem:[#allocation14 + $0x48] sm:$0xff]  ;;  %v2566_v17 = vld [vmem:[#allocation14 + $0x50] sm:$0xff]  ;;  %s2795_s24 = sld [smem:[#allocation6 + $0x3]]  ;;  %s2801_s26 = sld [smem:[#allocation6 + $0x1]] }
  0x53   :  { %2031 = vmatpush3.bf16.msra.mxu0 %v101_v3  ;;  %2063 = vmatpush3.bf16.msra.mxu1 %v101_v3  ;;  %v2283_v14 = vld [vmem:[#allocation11] sm:$0xff]   ;;  %v105_v16 = vpack.c.bf16 %v2562_v15, %v2558_v12  ;;  %v2568_v18 = vld [vmem:[#allocation14 + $0x58] sm:$0xff]  ;;  %v2574_v21 = vld [vmem:[#allocation14 + $0x68] sm:$0xff]  ;;  %s2803_s0 = sld [smem:[#allocation6 + $0x5]]  ;;  %s2805_s27 = sld [smem:[#allocation6 + $0x4]] }
  0x54   :  { %2032 = vmatprep.subr.bf16.mxu0 %v102_v5  ;;  %2064 = vmatprep.subr.bf16.mxu1 %v102_v5  ;;  %v106_v19 = vpack.c.bf16 %v2568_v18, %v2566_v17  ;;  %v2572_v20 = vld [vmem:[#allocation14 + $0x60] sm:$0xff]  ;;  %v2576_v22 = vld [vmem:[#allocation14 + $0x70] sm:$0xff]  ;;  %v2580_v24 = vld [vmem:[#allocation14 + $0x78] sm:$0xff]  ;;  %s2807_s28 = sld [smem:[#allocation6 + $0x7]]  ;;  %s2809_s29 = sld [smem:[#allocation10 + $0x5]] }
  0x55   :  { %2046 = vmatprep.mubr.bf16.mxu0 %v2280_v11  ;;  %2078 = vmatprep.mubr.bf16.mxu1 %v2283_v14  ;;  %v107_v23 = vpack.c.bf16 %v2574_v21, %v2572_v20  ;;  %v108_v25 = vpack.c.bf16 %v2580_v24, %v2576_v22  ;;  %v2281_v26 = vld [vmem:[#allocation11 + $0x8] sm:$0xff]   ;;  %v2282_v28 = vld [vmem:[#allocation11 + $0x10] sm:$0xff]   ;;  %v2284_v30 = vld [vmem:[#allocation11 + $0x18] sm:$0xff]   ;;  %s2811_s30 = sld [smem:[#allocation10 + $0x4]]  ;;  %s2813_s22 = sld [smem:[#allocation6 + $0x6]] }
  0x56   :  { %v2285_v27 = vld [vmem:[#allocation11 + $0x8] sm:$0xff]   ;;  %v2287_v29 = vld [vmem:[#allocation11 + $0x10] sm:$0xff]   ;;  %v2289_v31 = vld [vmem:[#allocation11 + $0x18] sm:$0xff]   ;;  %s2815_s7 = sld [smem:[#allocation10 + $0x7]]  ;;  %s2817_s8 = sld [smem:[#allocation10 + $0x6]] }
  0x57   :  { %2033 = vmatpush3.bf16.msra.mxu0 %v102_v5  ;;  %2065 = vmatpush3.bf16.msra.mxu1 %v102_v5  ;;  %v2286_v32 = vld [vmem:[#allocation11 + $0x20] sm:$0xff]   ;;  %v2288_v34 = vld [vmem:[#allocation11 + $0x28] sm:$0xff]   ;;  %v2290_v36 = vld [vmem:[#allocation11 + $0x30] sm:$0xff]   ;;  %s1754_s9 = scalar_lea.vmem [#allocation4], %s2779_s3  ;;  %s1728_s10 = scalar_lea.vmem [#allocation4], %s2781_s19 }
  0x58   :  { %2034 = vmatprep.subr.bf16.mxu0 %v103_v9  ;;  %2066 = vmatprep.subr.bf16.mxu1 %v103_v9  ;;  %v2291_v33 = vld [vmem:[#allocation11 + $0x20] sm:$0xff]   ;;  %v2293_v35 = vld [vmem:[#allocation11 + $0x28] sm:$0xff]   ;;  %v2294_v37 = vld [vmem:[#allocation11 + $0x30] sm:$0xff]   ;;  %s1756_s11 = scalar_lea.vmem [#allocation5], %s2785_s20  ;;  %s1730_s12 = scalar_lea.vmem [#allocation5], %s2789_s21 }
  0x59   :  { %v2292_v38 = vld [vmem:[#allocation11 + $0x38] sm:$0xff]   ;;  %v2296_v40 = vld [vmem:[#allocation12] sm:$0xff]   ;;  %s1768_s13 = scalar_lea.vmem [#allocation5], %s2791_s23  ;;  %s1744_s14 = scalar_lea.vmem [#allocation5], %s2797_s25 }
  0x5a   :  { %v2295_v39 = vld [vmem:[#allocation11 + $0x38] sm:$0xff]   ;;  %s1766_s15 = scalar_lea.vmem [#allocation4], %s2795_s24  ;;  %s1742_s16 = scalar_lea.vmem [#allocation4], %s2801_s26 }
  0x5b   :  { %2035 = vmatpush3.bf16.msra.mxu0 %v103_v9  ;;  %2067 = vmatpush3.bf16.msra.mxu1 %v103_v9  ;;  %s1792_s2 = scalar_lea.vmem [#allocation5], %s2809_s29  ;;  %s1780_s1 = scalar_lea.vmem [#allocation5], %s2811_s30 }
  0x5c   :  { %2036 = vmatprep.subr.bf16.mxu0 %v104_v13  ;;  %2068 = vmatprep.subr.bf16.mxu1 %v104_v13  ;;  %s1790_s6 = scalar_lea.vmem [#allocation4], %s2803_s0  ;;  %s1778_s17 = scalar_lea.vmem [#allocation4], %s2805_s27 }
  0x5d   :  { %s1816_s4 = scalar_lea.vmem [#allocation5], %s2815_s7  ;;  %s1804_s18 = scalar_lea.vmem [#allocation5], %s2817_s8 }
  0x5e   :  { %s1814_s3 = scalar_lea.vmem [#allocation4], %s2807_s28  ;;  %s1802_s19 = scalar_lea.vmem [#allocation4], %s2813_s22 }
  0x5f   :  { %2037 = vmatpush3.bf16.msra.mxu0 %v104_v13  ;;  %2069 = vmatpush3.bf16.msra.mxu1 %v104_v13 }
  0x60   :  { %2038 = vmatprep.subr.bf16.mxu0 %v105_v16  ;;  %2070 = vmatprep.subr.bf16.mxu1 %v105_v16 }
  0x63   :  { %2039 = vmatpush3.bf16.msra.mxu0 %v105_v16  ;;  %2071 = vmatpush3.bf16.msra.mxu1 %v105_v16 }
  0x64   :  { %2040 = vmatprep.subr.bf16.mxu0 %v106_v19  ;;  %2072 = vmatprep.subr.bf16.mxu1 %v106_v19 }
  0x67   :  { %2041 = vmatpush3.bf16.msra.mxu0 %v106_v19  ;;  %2073 = vmatpush3.bf16.msra.mxu1 %v106_v19 }
  0x68   :  { %2042 = vmatprep.subr.bf16.mxu0 %v107_v23  ;;  %2074 = vmatprep.subr.bf16.mxu1 %v107_v23 }
  0x6b   :  { %2043 = vmatpush3.bf16.msra.mxu0 %v107_v23  ;;  %2075 = vmatpush3.bf16.msra.mxu1 %v107_v23 }
  0x6c   :  { %2044 = vmatprep.subr.bf16.mxu0 %v108_v25  ;;  %2076 = vmatprep.subr.bf16.mxu1 %v108_v25 }
  0x6f   :  { %2045 = vmatpush3.bf16.msra.mxu0 %v108_v25  ;;  %2077 = vmatpush3.bf16.msra.mxu1 %v108_v25 }
  0x72   :  { %2047 = vmatmul.mubr.bf16.vlgmr.msra.gmra.mrb[0].mxu0 %v2281_v26  ;;  %2079 = vmatmul.mubr.bf16.vlgmr.msra.gmra.mrb[0].mxu1 %v2285_v27 }
  0x73   :  { %2050 = vmatprep.mubr.bf16.mxu0 %v2282_v28  ;;  %2082 = vmatprep.mubr.bf16.mxu1 %v2287_v29 }
  0x7a   :  { %2051 = vmatmul.mubr.bf16.gmra.mrb[4].mxu0 %v2284_v30  ;;  %2083 = vmatmul.mubr.bf16.gmra.mrb[4].mxu1 %v2289_v31 }
  0x7b   :  { %2054 = vmatprep.mubr.bf16.mxu0 %v2286_v32  ;;  %2086 = vmatprep.mubr.bf16.mxu1 %v2291_v33 }
  0x82   :  { %2055 = vmatmul.mubr.bf16.gmra.mrb[8].mxu0 %v2288_v34  ;;  %2087 = vmatmul.mubr.bf16.gmra.mrb[8].mxu1 %v2293_v35 }
  0x83   :  { %2058 = vmatprep.mubr.bf16.mxu0 %v2290_v36  ;;  %2090 = vmatprep.mubr.bf16.mxu1 %v2294_v37 }
  0x8a   :  { %2059 = vmatmul.mubr.bf16.gmra.mrb[12].mxu0 %v2292_v38  ;;  %2091 = vmatmul.mubr.bf16.gmra.mrb[12].mxu1 %v2295_v39 }
  0x8b   :  { %2110 = vmatprep.mubr.bf16.mxu0 %v2296_v40 }
 0x145   :  { %v2048_v41 = vpop.f32.mrb[0].mxu0  ;;  %v2080_v42 = vpop.f32.mrb[0].mxu1 }
 0x146   :  { %v207_v43 = vpop.f32.mrb[1].mxu0  ;;  %v2584_v44 = vadd.f32 %v2080_v42, %v2048_v41  ;;  %v432_v45 = vpop.f32.mrb[1].mxu1 }
 0x147   :  { %v2049_v46 = vpop.f32.mrb[2].mxu0  ;;  %v2586_v47 = vadd.f32 %v432_v45, %v207_v43  ;;  %v2081_v48 = vpop.f32.mrb[2].mxu1 }
 0x148   :  { %v271_v49 = vpack.c.bf16 %v2049_v46, %v2048_v41  ;;  %v210_v50 = vpop.f32.mrb[3].mxu0  ;;  %v2588_v51 = vadd.f32 %v2081_v48, %v2049_v46  ;;  %v2590_v52 = vpack.c.bf16 %v2081_v48, %v2080_v42  ;;  %v435_v53 = vpop.f32.mrb[3].mxu1 }
 0x149   :  { %v270_v54 = vpack.c.bf16 %v210_v50, %v207_v43  ;;  %v2592_v55 = vadd.f32 %v435_v53, %v210_v50  ;;  %v2594_v56 = vpack.c.bf16 %v435_v53, %v432_v45 }
 0x14b   :  { %2094 = vmatprep.subr.bf16.mxu0 %v270_v54 }
 0x14c   :  { %2095 = vmatpush3.bf16.msra.mxu0 %v270_v54 }
 0x14d   :  { %v2052_v57 = vpop.f32.mrb[4].mxu0  ;;  %2096 = vmatprep.subr.bf16.mxu0 %v271_v49  ;;  %v2084_v58 = vpop.f32.mrb[4].mxu1 }
 0x14e   :  { %v223_v59 = vpop.f32.mrb[5].mxu0  ;;  %v2596_v60 = vadd.f32 %v2084_v58, %v2052_v57  ;;  %v448_v61 = vpop.f32.mrb[5].mxu1 }
 0x14f   :  { %v2053_v62 = vpop.f32.mrb[6].mxu0  ;;  %v2598_v63 = vadd.f32 %v448_v61, %v223_v59  ;;  %v2085_v3 = vpop.f32.mrb[6].mxu1 }
 0x150   :  { %v273_v5 = vpack.c.bf16 %v2053_v62, %v2052_v57  ;;  %v226_v9 = vpop.f32.mrb[7].mxu0  ;;  %2097 = vmatpush3.bf16.msra.mxu0 %v271_v49  ;;  %v2600_v11 = vadd.f32 %v2085_v3, %v2053_v62  ;;  %v2602_v13 = vpack.c.bf16 %v2085_v3, %v2084_v58  ;;  %v451_v14 = vpop.f32.mrb[7].mxu1 }
 0x151   :  { %v272_v16 = vpack.c.bf16 %v226_v9, %v223_v59  ;;  %v2604_v19 = vadd.f32 %v451_v14, %v226_v9  ;;  %v762_v23 = vpack.c.bf16 %v451_v14, %v448_v61  ;;  %v2298_v9 = vld [vmem:[#allocation12 + $0x10] sm:$0xff]   ;;  %v2299_v14 = vld [vmem:[#allocation12 + $0x18] sm:$0xff]  }
 0x153   :  { %2098 = vmatprep.subr.bf16.mxu0 %v272_v16 }
 0x154   :  { %2099 = vmatpush3.bf16.msra.mxu0 %v272_v16  ;;  %v2300_v16 = vld [vmem:[#allocation12 + $0x20] sm:$0xff]  }
 0x155   :  { %v2056_v25 = vpop.f32.mrb[8].mxu0  ;;  %2100 = vmatprep.subr.bf16.mxu0 %v273_v5  ;;  %v2088_v26 = vpop.f32.mrb[8].mxu1 }
 0x156   :  { %v239_v27 = vpop.f32.mrb[9].mxu0  ;;  %v2606_v28 = vadd.f32 %v2088_v26, %v2056_v25  ;;  %v464_v29 = vpop.f32.mrb[9].mxu1 }
 0x157   :  { %v2057_v30 = vpop.f32.mrb[10].mxu0  ;;  %v2608_v31 = vadd.f32 %v464_v29, %v239_v27  ;;  %v2089_v32 = vpop.f32.mrb[10].mxu1 }
 0x158   :  { %v275_v33 = vpack.c.bf16 %v2057_v30, %v2056_v25  ;;  %v242_v34 = vpop.f32.mrb[11].mxu0  ;;  %2101 = vmatpush3.bf16.msra.mxu0 %v273_v5  ;;  %v2610_v35 = vadd.f32 %v2089_v32, %v2057_v30  ;;  %v765_v36 = vpack.c.bf16 %v2089_v32, %v2088_v26  ;;  %v467_v37 = vpop.f32.mrb[11].mxu1  ;;  %v2297_v5 = vld [vmem:[#allocation12 + $0x8] sm:$0xff]   ;;  %v2302_v26 = vld [vmem:[#allocation12 + $0x30] sm:$0xff]  }
 0x159   :  { %v274_v38 = vpack.c.bf16 %v242_v34, %v239_v27  ;;  %v2612_v39 = vadd.f32 %v467_v37, %v242_v34  ;;  %v764_v40 = vpack.c.bf16 %v467_v37, %v464_v29  ;;  %v2301_v25 = vld [vmem:[#allocation12 + $0x28] sm:$0xff]   ;;  %v2304_v27 = vld [vmem:[#allocation12] sm:$0xff]   ;;  %v2310_v32 = vld [vmem:[#allocation12 + $0x30] sm:$0xff]  }
 0x15a   :  { %v2308_v29 = vld [vmem:[#allocation12 + $0x20] sm:$0xff]   ;;  %v2309_v30 = vld [vmem:[#allocation12 + $0x28] sm:$0xff]  }
 0x15b   :  { %2102 = vmatprep.subr.bf16.mxu0 %v274_v38  ;;  %v2312_v34 = vld [vmem:[#allocation11] sm:$0xff]  }
 0x15c   :  { %2103 = vmatpush3.bf16.msra.mxu0 %v274_v38  ;;  %2142 = vmatprep.mubr.bf16.mxu1 %v2312_v34 }
 0x15d   :  { %v2060_v41 = vpop.f32.mrb[12].mxu0  ;;  %2104 = vmatprep.subr.bf16.mxu0 %v275_v33  ;;  %v2092_v42 = vpop.f32.mrb[12].mxu1 }
 0x15e   :  { %v255_v43 = vpop.f32.mrb[13].mxu0  ;;  %v2614_v45 = vadd.f32 %v2092_v42, %v2060_v41  ;;  %v480_v46 = vpop.f32.mrb[13].mxu1 }
 0x15f   :  { %v2061_v48 = vpop.f32.mrb[14].mxu0  ;;  %v2616_v49 = vadd.f32 %v480_v46, %v255_v43  ;;  %v2093_v50 = vpop.f32.mrb[14].mxu1 }
 0x160   :  { %v277_v53 = vpack.c.bf16 %v2061_v48, %v2060_v41  ;;  %v258_v54 = vpop.f32.mrb[15].mxu0  ;;  %2105 = vmatpush3.bf16.msra.mxu0 %v275_v33  ;;  %v2618_v57 = vadd.f32 %v2093_v50, %v2061_v48  ;;  %v767_v58 = vpack.c.bf16 %v2093_v50, %v2092_v42  ;;  %v483_v59 = vpop.f32.mrb[15].mxu1  ;;  %v2311_v33 = vld [vmem:[#allocation12 + $0x38] sm:$0xff]  }
 0x161   :  { %v276_v61 = vpack.c.bf16 %v258_v54, %v255_v43  ;;  %v2620_v62 = vadd.f32 %v483_v59, %v258_v54  ;;  %v766_v3 = vpack.c.bf16 %v483_v59, %v480_v46 }
 0x163   :  { %2106 = vmatprep.subr.bf16.mxu0 %v276_v61 }
 0x164   :  { %2107 = vmatpush3.bf16.msra.mxu0 %v276_v61 }
 0x165   :  { %2108 = vmatprep.subr.bf16.mxu0 %v277_v53 }
 0x168   :  { %2109 = vmatpush3.bf16.msra.mxu0 %v277_v53 }
 0x169   :  { %2158 = vmatprep.subr.bf16.mxu0 %v2594_v56 }
 0x16b   :  { %2111 = vmatmul.mubr.bf16.vlgmr.msra.gmra.mrb[16].mxu0 %v2297_v5 }
 0x16c   :  { %2159 = vmatpush3.bf16.msra.mxu0 %v2594_v56  ;;  %2114 = vmatprep.mubr.bf16.mxu0 %v2298_v9  ;;  %v2303_v56 = vld [vmem:[#allocation12 + $0x38] sm:$0xff]  }
 0x16d   :  { %2160 = vmatprep.subr.bf16.mxu0 %v2590_v52 }
 0x170   :  { %2161 = vmatpush3.bf16.msra.mxu0 %v2590_v52  ;;  %v2305_v52 = vld [vmem:[#allocation12 + $0x8] sm:$0xff]  }
 0x171   :  { %2162 = vmatprep.subr.bf16.mxu0 %v762_v23 }
 0x173   :  { %2115 = vmatmul.mubr.bf16.gmra.mrb[20].mxu0 %v2299_v14 }
 0x174   :  { %2163 = vmatpush3.bf16.msra.mxu0 %v762_v23  ;;  %2118 = vmatprep.mubr.bf16.mxu0 %v2300_v16  ;;  %v2306_v23 = vld [vmem:[#allocation12 + $0x10] sm:$0xff]  }
 0x175   :  { %2164 = vmatprep.subr.bf16.mxu0 %v2602_v13 }
 0x178   :  { %2165 = vmatpush3.bf16.msra.mxu0 %v2602_v13  ;;  %v2307_v13 = vld [vmem:[#allocation12 + $0x18] sm:$0xff]  }
 0x179   :  { %2166 = vmatprep.subr.bf16.mxu0 %v764_v40 }
 0x17b   :  { %2119 = vmatmul.mubr.bf16.gmra.mrb[24].mxu0 %v2301_v25 }
 0x17c   :  { %2167 = vmatpush3.bf16.msra.mxu0 %v764_v40  ;;  %2122 = vmatprep.mubr.bf16.mxu0 %v2302_v26 }
 0x17d   :  { %2168 = vmatprep.subr.bf16.mxu0 %v765_v36 }
 0x180   :  { %2169 = vmatpush3.bf16.msra.mxu0 %v765_v36 }
 0x181   :  { %2170 = vmatprep.subr.bf16.mxu0 %v766_v3 }
 0x183   :  { %2123 = vmatmul.mubr.bf16.gmra.mrb[28].mxu0 %v2303_v56 }
 0x184   :  { %2171 = vmatpush3.bf16.msra.mxu0 %v766_v3  ;;  %2174 = vmatprep.mubr.bf16.mxu0 %v2304_v27 }
 0x185   :  { %2172 = vmatprep.subr.bf16.mxu0 %v767_v58 }
 0x188   :  { %2173 = vmatpush3.bf16.msra.mxu0 %v767_v58 }
 0x18b   :  { %2175 = vmatmul.mubr.bf16.vlgmr.msra.gmra.mrb[32].mxu0 %v2305_v52 }
 0x18c   :  { %2178 = vmatprep.mubr.bf16.mxu0 %v2306_v23 }
 0x193   :  { %2179 = vmatmul.mubr.bf16.gmra.mrb[36].mxu0 %v2307_v13 }
 0x194   :  { %2182 = vmatprep.mubr.bf16.mxu0 %v2308_v29 }
 0x19b   :  { %2183 = vmatmul.mubr.bf16.gmra.mrb[40].mxu0 %v2309_v30 }
 0x19c   :  { %2186 = vmatprep.mubr.bf16.mxu0 %v2310_v32 }
 0x1a3   :  { %2187 = vmatmul.mubr.bf16.gmra.mrb[44].mxu0 %v2311_v33 }
 0x23e   :  { %v2112_v36 = vpop.f32.mrb[16].mxu0 }
 0x23f   :  { %v601_v37 = vpop.f32.mrb[17].mxu0  ;;  %v730_v52 = vadd.f32 %v2112_v36, %v2540_v2 }
 0x240   :  { %v2113_v38 = vpop.f32.mrb[18].mxu0  ;;  %v728_v23 = vadd.f32 %v601_v37, %v2536_v0 }
 0x241   :  { %v777_v40 = vpack.c.bf16 %v2113_v38, %v2112_v36  ;;  %v604_v41 = vpop.f32.mrb[19].mxu0  ;;  %v731_v29 = vadd.f32 %v2113_v38, %v2544_v4  ;;  %v2314_v36 = vld [vmem:[#allocation11 + $0x10] sm:$0xff]  }
 0x242   :  { %v776_v42 = vpack.c.bf16 %v604_v41, %v601_v37  ;;  %v729_v33 = vadd.f32 %v604_v41, %v2538_v1 }
 0x244   :  { %2126 = vmatprep.subr.bf16.mxu1 %v776_v42 }
 0x245   :  { %2127 = vmatpush3.bf16.msra.mxu1 %v776_v42  ;;  %v2313_v42 = vld [vmem:[#allocation11 + $0x8] sm:$0xff]  }
 0x246   :  { %v2116_v43 = vpop.f32.mrb[20].mxu0  ;;  %2128 = vmatprep.subr.bf16.mxu1 %v777_v40 }
 0x247   :  { %v617_v46 = vpop.f32.mrb[21].mxu0  ;;  %v734_v4 = vadd.f32 %v2116_v43, %v2552_v8 }
 0x248   :  { %v2117_v48 = vpop.f32.mrb[22].mxu0  ;;  %v732_v1 = vadd.f32 %v617_v46, %v2548_v6 }
 0x249   :  { %v779_v50 = vpack.c.bf16 %v2117_v48, %v2116_v43  ;;  %v620_v53 = vpop.f32.mrb[23].mxu0  ;;  %2129 = vmatpush3.bf16.msra.mxu1 %v777_v40  ;;  %v735_v41 = vadd.f32 %v2117_v48, %v2556_v10 }
 0x24a   :  { %v778_v54 = vpack.c.bf16 %v620_v53, %v617_v46 }
 0x24c   :  { %2130 = vmatprep.subr.bf16.mxu1 %v778_v54 }
 0x24d   :  { %2131 = vmatpush3.bf16.msra.mxu1 %v778_v54 }
 0x24e   :  { %v2120_v58 = vpop.f32.mrb[24].mxu0  ;;  %2132 = vmatprep.subr.bf16.mxu1 %v779_v50 }
 0x24f   :  { %v2628_v59 = vpop.f32.mrb[25].mxu0  ;;  %v738_v10 = vadd.f32 %v2120_v58, %v2566_v17  ;;  %v2317_v17 = vld [vmem:[#allocation11 + $0x28] sm:$0xff]  }
 0x250   :  { %v2630_v61 = vpop.f32.mrb[26].mxu0 }
 0x251   :  { %v781_v3 = vpack.c.bf16 %v2630_v61, %v2120_v58  ;;  %v2633_v5 = vpop.f32.mrb[27].mxu0  ;;  %2133 = vmatpush3.bf16.msra.mxu1 %v779_v50 }
 0x252   :  { %v780_v9 = vpack.c.bf16 %v2633_v5, %v2628_v59 }
 0x254   :  { %2134 = vmatprep.subr.bf16.mxu1 %v780_v9 }
 0x255   :  { %2135 = vmatpush3.bf16.msra.mxu1 %v780_v9 }
 0x256   :  { %v2637_v14 = vpop.f32.mrb[28].mxu0  ;;  %2136 = vmatprep.subr.bf16.mxu1 %v781_v3 }
 0x257   :  { %v2639_v16 = vpop.f32.mrb[29].mxu0 }
 0x258   :  { %v2641_v25 = vpop.f32.mrb[30].mxu0 }
 0x259   :  { %v783_v26 = vpack.c.bf16 %v2641_v25, %v2637_v14  ;;  %v2645_v56 = vpop.f32.mrb[31].mxu0  ;;  %2137 = vmatpush3.bf16.msra.mxu1 %v781_v3 }
 0x25a   :  { %v782_v27 = vpack.c.bf16 %v2645_v56, %v2639_v16 }
 0x25c   :  { %2138 = vmatprep.subr.bf16.mxu1 %v782_v27 }
 0x25d   :  { %2139 = vmatpush3.bf16.msra.mxu1 %v782_v27 }
 0x25e   :  { %2140 = vmatprep.subr.bf16.mxu1 %v783_v26  ;;  %v2176_v13 = vpop.f32.mrb[32].mxu0 }
 0x25f   :  { %v2652_v30 = vadd.f32 %v2176_v13, %v730_v52  ;;  %v1067_v32 = vpop.f32.mrb[33].mxu0 }
 0x260   :  { %v2655_v34 = vadd.f32 %v1067_v32, %v728_v23  ;;  %v2177_v40 = vpop.f32.mrb[34].mxu0  ;;  %v2315_v23 = vld [vmem:[#allocation11 + $0x18] sm:$0xff]  }
 0x261   :  { %v2657_v50 = vadd.f32 %v2177_v40, %v731_v29  ;;  %v1243_v54 = vpack.c.bf16 %v2177_v40, %v2176_v13  ;;  %2141 = vmatpush3.bf16.msra.mxu1 %v783_v26  ;;  %v1070_v2 = vpop.f32.mrb[35].mxu0  ;;  %v733_v26 = vadd.f32 %v620_v53, %v2550_v7  ;;  %v2316_v29 = vld [vmem:[#allocation11 + $0x20] sm:$0xff]   ;;  %v736_v7 = vadd.f32 %v2628_v59, %v2558_v12  ;;  %v2318_v12 = vld [vmem:[#allocation11 + $0x30] sm:$0xff]  }
 0x262   :  { %v2659_v0 = vadd.f32 %v1070_v2, %v729_v33  ;;  %v1242_v37 = vpack.c.bf16 %v1070_v2, %v1067_v32  ;;  %v739_v53 = vadd.f32 %v2630_v61, %v2568_v18  ;;  %v737_v40 = vadd.f32 %v2633_v5, %v2562_v15 }
 0x263   :  { %v742_v18 = vadd.f32 %v2637_v14, %v2576_v22  ;;  %v740_v15 = vadd.f32 %v2639_v16, %v2572_v20  ;;  %v743_v5 = vadd.f32 %v2641_v25, %v2580_v24  ;;  %v2319_v22 = vld [vmem:[#allocation11 + $0x38] sm:$0xff]   ;;  %v2320_v20 = vld [vmem:[#allocation11] sm:$0xff]   ;;  %v2321_v24 = vld [vmem:[#allocation11 + $0x8] sm:$0xff]  }
 0x264   :  { %2143 = vmatmul.mubr.bf16.vlgmr.msra.gmra.mrb[16].mxu1 %v2313_v42  ;;  %2190 = vmatprep.subr.bf16.mxu1 %v1242_v37  ;;  %v2323_v25 = vld [vmem:[#allocation11 + $0x18] sm:$0xff]  }
 0x265   :  { %2191 = vmatpush3.bf16.msra.mxu1 %v1242_v37  ;;  %2146 = vmatprep.mubr.bf16.mxu1 %v2314_v36 }
 0x266   :  { %v2180_v38 = vpop.f32.mrb[36].mxu0  ;;  %2192 = vmatprep.subr.bf16.mxu1 %v1243_v54 }
 0x267   :  { %v2664_v3 = vadd.f32 %v2180_v38, %v734_v4  ;;  %v1083_v9 = vpop.f32.mrb[37].mxu0 }
 0x268   :  { %v2667_v27 = vadd.f32 %v1083_v9, %v732_v1  ;;  %v2181_v52 = vpop.f32.mrb[38].mxu0 }
 0x269   :  { %v2669_v13 = vadd.f32 %v2181_v52, %v735_v41  ;;  %v1245_v8 = vpack.c.bf16 %v2181_v52, %v2180_v38  ;;  %v1086_v43 = vpop.f32.mrb[39].mxu0  ;;  %2193 = vmatpush3.bf16.msra.mxu1 %v1243_v54  ;;  %v741_v38 = vadd.f32 %v2645_v56, %v2574_v21  ;;  %v2322_v21 = vld [vmem:[#allocation11 + $0x10] sm:$0xff]   ;;  %v2324_v56 = vld [vmem:[#allocation11 + $0x20] sm:$0xff]  }
 0x26a   :  { %v2671_v6 = vadd.f32 %v1086_v43, %v733_v26  ;;  %v1244_v46 = vpack.c.bf16 %v1086_v43, %v1083_v9  ;;  %v2326_v43 = vld [vmem:[#allocation11 + $0x30] sm:$0xff]  }
 0x26c   :  { %2147 = vmatmul.mubr.bf16.gmra.mrb[20].mxu1 %v2315_v23  ;;  %2194 = vmatprep.subr.bf16.mxu1 %v1244_v46 }
 0x26d   :  { %2195 = vmatpush3.bf16.msra.mxu1 %v1244_v46  ;;  %2150 = vmatprep.mubr.bf16.mxu1 %v2316_v29  ;;  %v2327_v29 = vld [vmem:[#allocation11 + $0x38] sm:$0xff]   ;;  %v2328_v46 = vld [vmem:[#allocation12] sm:$0xff]  }
 0x26e   :  { %v2184_v48 = vpop.f32.mrb[40].mxu0  ;;  %2196 = vmatprep.subr.bf16.mxu1 %v1245_v8  ;;  %2238 = vmatprep.mubr.bf16.mxu0 %v2328_v46  ;;  %v2330_v46 = vld [vmem:[#allocation12 + $0x8] sm:$0xff]  }
 0x26f   :  { %v2678_v32 = vadd.f32 %v2184_v48, %v738_v10  ;;  %v1099_v33 = vpop.f32.mrb[41].mxu0  ;;  %v2329_v10 = vld [vmem:[#allocation12 + $0x20] sm:$0xff]  }
 0x270   :  { %v2682_v42 = vadd.f32 %v1099_v33, %v736_v7  ;;  %v2185_v54 = vpop.f32.mrb[42].mxu0 }
 0x271   :  { %v2684_v58 = vadd.f32 %v2185_v54, %v739_v53  ;;  %v1247_v2 = vpack.c.bf16 %v2185_v54, %v2184_v48  ;;  %v1102_v36 = vpop.f32.mrb[43].mxu0  ;;  %2197 = vmatpush3.bf16.msra.mxu1 %v1245_v8  ;;  %v2325_v8 = vld [vmem:[#allocation11 + $0x28] sm:$0xff]  }
 0x272   :  { %v2686_v59 = vadd.f32 %v1102_v36, %v737_v40  ;;  %v1246_v37 = vpack.c.bf16 %v1102_v36, %v1099_v33 }
 0x274   :  { %2151 = vmatmul.mubr.bf16.gmra.mrb[24].mxu1 %v2317_v17  ;;  %2198 = vmatprep.subr.bf16.mxu1 %v1246_v37 }
 0x275   :  { %2199 = vmatpush3.bf16.msra.mxu1 %v1246_v37  ;;  %2154 = vmatprep.mubr.bf16.mxu1 %v2318_v12 }
 0x276   :  { %v2188_v61 = vpop.f32.mrb[44].mxu0  ;;  %2200 = vmatprep.subr.bf16.mxu1 %v1247_v2 }
 0x277   :  { %v2694_v4 = vadd.f32 %v2188_v61, %v742_v18  ;;  %v1115_v1 = vpop.f32.mrb[45].mxu0 }
 0x278   :  { %v2698_v41 = vadd.f32 %v1115_v1, %v740_v15  ;;  %v2189_v9 = vpop.f32.mrb[46].mxu0 }
 0x279   :  { %v2700_v14 = vadd.f32 %v2189_v9, %v743_v5  ;;  %v1249_v26 = vpack.c.bf16 %v2189_v9, %v2188_v61  ;;  %v1118_v52 = vpop.f32.mrb[47].mxu0  ;;  %2201 = vmatpush3.bf16.msra.mxu1 %v1247_v2 }
 0x27a   :  { %v2702_v16 = vadd.f32 %v1118_v52, %v741_v38  ;;  %v1248_v23 = vpack.c.bf16 %v1118_v52, %v1115_v1 }
 0x27c   :  { %2155 = vmatmul.mubr.bf16.gmra.mrb[28].mxu1 %v2319_v22  ;;  %2202 = vmatprep.subr.bf16.mxu1 %v1248_v23 }
 0x27d   :  { %2203 = vmatpush3.bf16.msra.mxu1 %v1248_v23  ;;  %2206 = vmatprep.mubr.bf16.mxu1 %v2320_v20 }
 0x27e   :  { %2204 = vmatprep.subr.bf16.mxu1 %v1249_v26 }
 0x281   :  { %2205 = vmatpush3.bf16.msra.mxu1 %v1249_v26 }
 0x284   :  { %2207 = vmatmul.mubr.bf16.vlgmr.msra.gmra.mrb[32].mxu1 %v2321_v24 }
 0x285   :  { %2210 = vmatprep.mubr.bf16.mxu1 %v2322_v21 }
 0x28c   :  { %2211 = vmatmul.mubr.bf16.gmra.mrb[36].mxu1 %v2323_v25 }
 0x28d   :  { %2214 = vmatprep.mubr.bf16.mxu1 %v2324_v56 }
 0x294   :  { %2215 = vmatmul.mubr.bf16.gmra.mrb[40].mxu1 %v2325_v8 }
 0x295   :  { %2218 = vmatprep.mubr.bf16.mxu1 %v2326_v43 }
 0x29c   :  { %2219 = vmatmul.mubr.bf16.gmra.mrb[44].mxu1 %v2327_v29 }
 0x29d   :  { %2246 = vmatprep.mubr.bf16.mxu1 %v2329_v10  ;;  %v2331_v10 = vld [vmem:[#allocation12 + $0x28] sm:$0xff]  }
 0x337   :  { %v2144_v7 = vpop.f32.mrb[16].mxu1 }
 0x338   :  { %v2705_v48 = vadd.f32 %v2144_v7, %v2584_v44  ;;  %v898_v53 = vpop.f32.mrb[17].mxu1 }
 0x339   :  { %v2708_v33 = vadd.f32 %v898_v53, %v2586_v47  ;;  %v2145_v40 = vpop.f32.mrb[18].mxu1 }
 0x33a   :  { %v2711_v54 = vadd.f32 %v2145_v40, %v2588_v51  ;;  %v1227_v17 = vpack.c.bf16 %v2145_v40, %v2144_v7  ;;  %v901_v2 = vpop.f32.mrb[19].mxu1  ;;  %v2333_v40 = vld [vmem:[#allocation12 + $0x30] sm:$0xff]  }
 0x33b   :  { %v2714_v36 = vadd.f32 %v901_v2, %v2592_v55  ;;  %v1226_v12 = vpack.c.bf16 %v901_v2, %v898_v53  ;;  %v2332_v53 = vld [vmem:[#allocation12 + $0x10] sm:$0xff]  }
 0x33d   :  { %2222 = vmatprep.subr.bf16.mxu0 %v1226_v12  ;;  %2254 = vmatprep.subr.bf16.mxu1 %v1226_v12 }
 0x33e   :  { %2223 = vmatpush3.bf16.msra.mxu0 %v1226_v12  ;;  %2262 = vmatpush3.bf16.msra.mxu1 %v1226_v12 }
 0x33f   :  { %v2148_v44 = vpop.f32.mrb[20].mxu1  ;;  %2224 = vmatprep.subr.bf16.mxu0 %v1227_v17  ;;  %2255 = vmatprep.subr.bf16.mxu1 %v1227_v17 }
 0x340   :  { %v2717_v47 = vadd.f32 %v2148_v44, %v2596_v60  ;;  %v914_v37 = vpop.f32.mrb[21].mxu1 }
 0x341   :  { %v2720_v51 = vadd.f32 %v914_v37, %v2598_v63  ;;  %v2149_v18 = vpop.f32.mrb[22].mxu1 }
 0x342   :  { %v2723_v15 = vadd.f32 %v2149_v18, %v2600_v11  ;;  %v1229_v55 = vpack.c.bf16 %v2149_v18, %v2148_v44  ;;  %v917_v61 = vpop.f32.mrb[23].mxu1  ;;  %2225 = vmatpush3.bf16.msra.mxu0 %v1227_v17  ;;  %2263 = vmatpush3.bf16.msra.mxu1 %v1227_v17  ;;  %v2334_v44 = vld [vmem:[#allocation12 + $0x18] sm:$0xff]  }
 0x343   :  { %v2726_v5 = vadd.f32 %v917_v61, %v2604_v19  ;;  %v1228_v1 = vpack.c.bf16 %v917_v61, %v914_v37  ;;  %v2335_v37 = vld [vmem:[#allocation12 + $0x38] sm:$0xff]  }
 0x345   :  { %2226 = vmatprep.subr.bf16.mxu0 %v1228_v1  ;;  %2256 = vmatprep.subr.bf16.mxu1 %v1228_v1 }
 0x346   :  { %2227 = vmatpush3.bf16.msra.mxu0 %v1228_v1  ;;  %2264 = vmatpush3.bf16.msra.mxu1 %v1228_v1 }
 0x347   :  { %v2152_v60 = vpop.f32.mrb[24].mxu1  ;;  %2228 = vmatprep.subr.bf16.mxu0 %v1229_v55  ;;  %2257 = vmatprep.subr.bf16.mxu1 %v1229_v55 }
 0x348   :  { %v2729_v63 = vadd.f32 %v2152_v60, %v2606_v28  ;;  %v930_v11 = vpop.f32.mrb[25].mxu1 }
 0x349   :  { %v2732_v38 = vadd.f32 %v930_v11, %v2608_v31  ;;  %v2153_v9 = vpop.f32.mrb[26].mxu1 }
 0x34a   :  { %v2735_v22 = vadd.f32 %v2153_v9, %v2610_v35  ;;  %v1231_v19 = vpack.c.bf16 %v2153_v9, %v2152_v60  ;;  %v933_v26 = vpop.f32.mrb[27].mxu1  ;;  %2229 = vmatpush3.bf16.msra.mxu0 %v1229_v55  ;;  %2265 = vmatpush3.bf16.msra.mxu1 %v1229_v55 }
 0x34b   :  { %v2738_v52 = vadd.f32 %v933_v26, %v2612_v39  ;;  %v1230_v20 = vpack.c.bf16 %v933_v26, %v930_v11 }
 0x34d   :  { %2230 = vmatprep.subr.bf16.mxu0 %v1230_v20  ;;  %2258 = vmatprep.subr.bf16.mxu1 %v1230_v20 }
 0x34e   :  { %2231 = vmatpush3.bf16.msra.mxu0 %v1230_v20  ;;  %2266 = vmatpush3.bf16.msra.mxu1 %v1230_v20 }
 0x34f   :  { %v2156_v28 = vpop.f32.mrb[28].mxu1  ;;  %2232 = vmatprep.subr.bf16.mxu0 %v1231_v19  ;;  %2259 = vmatprep.subr.bf16.mxu1 %v1231_v19 }
 0x350   :  { %v2741_v31 = vadd.f32 %v2156_v28, %v2614_v45  ;;  %v946_v35 = vpop.f32.mrb[29].mxu1 }
 0x351   :  { %v2744_v23 = vadd.f32 %v946_v35, %v2616_v49  ;;  %v2157_v24 = vpop.f32.mrb[30].mxu1 }
 0x352   :  { %v2747_v21 = vadd.f32 %v2157_v24, %v2618_v57  ;;  %v1233_v39 = vpack.c.bf16 %v2157_v24, %v2156_v28  ;;  %v949_v25 = vpop.f32.mrb[31].mxu1  ;;  %2233 = vmatpush3.bf16.msra.mxu0 %v1231_v19  ;;  %2267 = vmatpush3.bf16.msra.mxu1 %v1231_v19 }
 0x353   :  { %v2750_v56 = vadd.f32 %v949_v25, %v2620_v62  ;;  %v1232_v8 = vpack.c.bf16 %v949_v25, %v946_v35 }
 0x355   :  { %2234 = vmatprep.subr.bf16.mxu0 %v1232_v8  ;;  %2260 = vmatprep.subr.bf16.mxu1 %v1232_v8 }
 0x356   :  { %2235 = vmatpush3.bf16.msra.mxu0 %v1232_v8  ;;  %2268 = vmatpush3.bf16.msra.mxu1 %v1232_v8 }
 0x357   :  { %v2208_v45 = vpop.f32.mrb[32].mxu1  ;;  %2236 = vmatprep.subr.bf16.mxu0 %v1233_v39  ;;  %2261 = vmatprep.subr.bf16.mxu1 %v1233_v39 }
 0x358   :  { %v1614_v49 = vadd.f32 %v2208_v45, %v2705_v48  ;;  %v1364_v43 = vpop.f32.mrb[33].mxu1 }
 0x359   :  { %v1612_v57 = vadd.f32 %v1364_v43, %v2708_v33  ;;  %v2209_v29 = vpop.f32.mrb[34].mxu1 }
 0x35a   :  { %1630 = vst [vmem:[#allocation4 + $0x10] sm:$0xff] %v1614_v49  ;;  %v1615_v62 = vadd.f32 %v2209_v29, %v2711_v54  ;;  %v1367_v7 = vpop.f32.mrb[35].mxu1  ;;  %2237 = vmatpush3.bf16.msra.mxu0 %v1233_v39  ;;  %2269 = vmatpush3.bf16.msra.mxu1 %v1233_v39 }
 0x35b   :  { %1628 = vst [vmem:[#allocation4] sm:$0xff] %v1612_v57  ;;  %v1613_v17 = vadd.f32 %v1367_v7, %v2714_v36 }
 0x35c   :  { %1631 = vst [vmem:[#allocation4 + $0x18] sm:$0xff] %v1615_v62 }
 0x35d   :  { %1629 = vst [vmem:[#allocation4 + $0x8] sm:$0xff] %v1613_v17  ;;  %2239 = vmatmul.mubr.bf16.vlgmr.msra.gmra.mrb[48].mxu0 %v2330_v46  ;;  %2247 = vmatmul.mubr.bf16.vlgmr.msra.gmra.mrb[48].mxu1 %v2331_v10 }
 0x35e   :  { %2242 = vmatprep.mubr.bf16.mxu0 %v2332_v53  ;;  %2250 = vmatprep.mubr.bf16.mxu1 %v2333_v40 }
 0x35f   :  { %v2212_v48 = vpop.f32.mrb[36].mxu1 }
 0x360   :  { %v1618_v33 = vadd.f32 %v2212_v48, %v2717_v47  ;;  %v1380_v2 = vpop.f32.mrb[37].mxu1 }
 0x361   :  { %v1616_v54 = vadd.f32 %v1380_v2, %v2720_v51  ;;  %v2213_v12 = vpop.f32.mrb[38].mxu1 }
 0x362   :  { %1634 = vst [vmem:[#allocation4 + $0x30] sm:$0xff] %v1618_v33  ;;  %v1619_v18 = vadd.f32 %v2213_v12, %v2723_v15  ;;  %v1383_v55 = vpop.f32.mrb[39].mxu1 }
 0x363   :  { %1632 = vst [vmem:[#allocation4 + $0x20] sm:$0xff] %v1616_v54  ;;  %v1617_v36 = vadd.f32 %v1383_v55, %v2726_v5 }
 0x364   :  { %1635 = vst [vmem:[#allocation4 + $0x38] sm:$0xff] %v1619_v18 }
 0x365   :  { %1633 = vst [vmem:[#allocation4 + $0x28] sm:$0xff] %v1617_v36  ;;  %2243 = vmatmul.mubr.bf16.gmra.mrb[52].mxu0 %v2334_v44  ;;  %2251 = vmatmul.mubr.bf16.gmra.mrb[52].mxu1 %v2335_v37 }
 0x367   :  { %v2216_v61 = vpop.f32.mrb[40].mxu1 }
 0x368   :  { %v1622_v47 = vadd.f32 %v2216_v61, %v2729_v63  ;;  %v1396_v1 = vpop.f32.mrb[41].mxu1 }
 0x369   :  { %v1620_v51 = vadd.f32 %v1396_v1, %v2732_v38  ;;  %v2217_v60 = vpop.f32.mrb[42].mxu1 }
 0x36a   :  { %1638 = vst [vmem:[#allocation4 + $0x50] sm:$0xff] %v1622_v47  ;;  %v1623_v11 = vadd.f32 %v2217_v60, %v2735_v22  ;;  %v1399_v9 = vpop.f32.mrb[43].mxu1 }
 0x36b   :  { %1636 = vst [vmem:[#allocation4 + $0x40] sm:$0xff] %v1620_v51  ;;  %v1621_v15 = vadd.f32 %v1399_v9, %v2738_v52  ;;  %v2441_v52 = vmov 0.0  }
 0x36c   :  { %1639 = vst [vmem:[#allocation4 + $0x58] sm:$0xff] %v1623_v11  ;;  %1725 = vst.msk [vmem:[%s2880_s5] sm:$0xff] %vm1724_vm0, %v2441_v52 }
 0x36d   :  { %1637 = vst [vmem:[#allocation4 + $0x48] sm:$0xff] %v1621_v15 }
 0x36f   :  { %v2220_v5 = vpop.f32.mrb[44].mxu1 }
 0x370   :  { %v1626_v19 = vadd.f32 %v2220_v5, %v2741_v31  ;;  %v1412_v26 = vpop.f32.mrb[45].mxu1 }
 0x371   :  { %v1624_v20 = vadd.f32 %v1412_v26, %v2744_v23  ;;  %v2221_v63 = vpop.f32.mrb[46].mxu1 }
 0x372   :  { %1642 = vst [vmem:[#allocation4 + $0x70] sm:$0xff] %v1626_v19  ;;  %v1627_v38 = vadd.f32 %v2221_v63, %v2747_v21  ;;  %v1415_v28 = vpop.f32.mrb[47].mxu1 }
 0x373   :  { %1640 = vst [vmem:[#allocation4 + $0x60] sm:$0xff] %v1624_v20  ;;  %v1625_v22 = vadd.f32 %v1415_v28, %v2750_v56 }
 0x374   :  { %1643 = vst [vmem:[#allocation4 + $0x78] sm:$0xff] %v1627_v38 }
 0x375   :  { %1641 = vst [vmem:[#allocation4 + $0x68] sm:$0xff] %v1625_v22 }
 0x37c   :  { %v1767_v54 = vld [vmem:[%s1766_s15] sm:$0x1] }
 0x37d   :  { %v1743_v12 = vld [vmem:[%s1742_s16] sm:$0x1] }
 0x37e   :  { %v1791_v47 = vld [vmem:[%s1790_s6] sm:$0x1] }
 0x37f   :  { %v1779_v1 = vld [vmem:[%s1778_s17] sm:$0x1] }
 0x380   :  { %v1815_v19 = vld [vmem:[%s1814_s3] sm:$0x1] }
 0x381   :  { %v1803_v26 = vld [vmem:[%s1802_s19] sm:$0x1] }
 0x430   :  { %v2240_v31 = vpop.f32.mrb[48].mxu0  ;;  %v2248_v35 = vpop.f32.mrb[48].mxu1 }
 0x431   :  { %v1662_v23 = vadd.f32 %v2240_v31, %v2652_v30  ;;  %v1670_v24 = vadd.f32 %v2248_v35, %v2678_v32  ;;  %v1533_v39 = vpop.f32.mrb[49].mxu0  ;;  %v1565_v21 = vpop.f32.mrb[49].mxu1 }
 0x432   :  { %v1660_v25 = vadd.f32 %v1533_v39, %v2655_v34  ;;  %v1668_v56 = vadd.f32 %v1565_v21, %v2682_v42  ;;  %v2241_v8 = vpop.f32.mrb[50].mxu0  ;;  %v2249_v45 = vpop.f32.mrb[50].mxu1 }
 0x433   :  { %1678 = vst [vmem:[#allocation5 + $0x10] sm:$0xff] %v1662_v23  ;;  %1686 = vst [vmem:[#allocation5 + $0x50] sm:$0xff] %v1670_v24  ;;  %v1663_v49 = vadd.f32 %v2241_v8, %v2657_v50  ;;  %v1671_v43 = vadd.f32 %v2249_v45, %v2684_v58  ;;  %v1536_v57 = vpop.f32.mrb[51].mxu0  ;;  %v1568_v29 = vpop.f32.mrb[51].mxu1 }
 0x434   :  { %1676 = vst [vmem:[#allocation5] sm:$0xff] %v1660_v25  ;;  %1684 = vst [vmem:[#allocation5 + $0x40] sm:$0xff] %v1668_v56  ;;  %v1661_v30 = vadd.f32 %v1536_v57, %v2659_v0  ;;  %v1669_v32 = vadd.f32 %v1568_v29, %v2686_v59 }
 0x435   :  { %1679 = vst [vmem:[#allocation5 + $0x18] sm:$0xff] %v1663_v49  ;;  %1687 = vst [vmem:[#allocation5 + $0x58] sm:$0xff] %v1671_v43 }
 0x436   :  { %1677 = vst [vmem:[#allocation5 + $0x8] sm:$0xff] %v1661_v30  ;;  %1685 = vst [vmem:[#allocation5 + $0x48] sm:$0xff] %v1669_v32 }
 0x438   :  { %v2244_v34 = vpop.f32.mrb[52].mxu0  ;;  %v2252_v42 = vpop.f32.mrb[52].mxu1 }
 0x439   :  { %v1666_v50 = vadd.f32 %v2244_v34, %v2664_v3  ;;  %v1674_v58 = vadd.f32 %v2252_v42, %v2694_v4  ;;  %v1549_v46 = vpop.f32.mrb[53].mxu0  ;;  %v1581_v10 = vpop.f32.mrb[53].mxu1 }
 0x43a   :  { %v1664_v0 = vadd.f32 %v1549_v46, %v2667_v27  ;;  %v1672_v59 = vadd.f32 %v1581_v10, %v2698_v41  ;;  %v2245_v62 = vpop.f32.mrb[54].mxu0  ;;  %v2253_v7 = vpop.f32.mrb[54].mxu1 }
 0x43b   :  { %1682 = vst [vmem:[#allocation5 + $0x30] sm:$0xff] %v1666_v50  ;;  %1690 = vst [vmem:[#allocation5 + $0x70] sm:$0xff] %v1674_v58  ;;  %v1667_v3 = vadd.f32 %v2245_v62, %v2669_v13  ;;  %v1675_v4 = vadd.f32 %v2253_v7, %v2700_v14  ;;  %v1552_v53 = vpop.f32.mrb[55].mxu0  ;;  %v1584_v40 = vpop.f32.mrb[55].mxu1  ;;  %v1755_v13 = vld [vmem:[%s1754_s9] sm:$0x1] }
 0x43c   :  { %1680 = vst [vmem:[#allocation5 + $0x20] sm:$0xff] %v1664_v0  ;;  %1688 = vst [vmem:[#allocation5 + $0x60] sm:$0xff] %v1672_v59  ;;  %v1665_v27 = vadd.f32 %v1552_v53, %v2671_v6  ;;  %v1673_v41 = vadd.f32 %v1584_v40, %v2702_v16  ;;  %v1729_v6 = vld [vmem:[%s1728_s10] sm:$0x1] }
 0x43d   :  { %1683 = vst [vmem:[#allocation5 + $0x38] sm:$0xff] %v1667_v3  ;;  %1691 = vst [vmem:[#allocation5 + $0x78] sm:$0xff] %v1675_v4 }
 0x43e   :  { %1681 = vst [vmem:[#allocation5 + $0x28] sm:$0xff] %v1665_v27  ;;  %1689 = vst [vmem:[#allocation5 + $0x68] sm:$0xff] %v1673_v41 }
 0x445   :  { %v1757_v14 = vld [vmem:[%s1756_s11] sm:$0x1] }
 0x446   :  { %v1731_v16 = vld [vmem:[%s1730_s12] sm:$0x1]  ;;  %v1758_v48 = vmul.f32 %v1757_v14, %v1755_v13 }
 0x447   :  { %v1769_v17 = vld [vmem:[%s1768_s13] sm:$0x1]  ;;  %v1732_v33 = vmul.f32 %v1731_v16, %v1729_v6 }
 0x448   :  { %v1745_v2 = vld [vmem:[%s1744_s14] sm:$0x1]  ;;  %v1759_v44 = vsel %vm1733_vm1, %v1758_v48, 0.0  ;;  %v1770_v18 = vmul.f32 %v1769_v17, %v1767_v54 }
 0x449   :  { %v1734_v37 = vsel %vm1733_vm1, %v1732_v33, 0.0  ;;  %v1746_v55 = vmul.f32 %v1745_v2, %v1743_v12  ;;  %1760 = vadd.xlane.f32.xlu1 %v1759_v44  ;;  %v1793_v36 = vld [vmem:[%s1792_s2] sm:$0x1] }
 0x44a   :  { %1735 = vadd.xlane.f32.xlu0 %v1734_v37  ;;  %v1781_v61 = vld [vmem:[%s1780_s1] sm:$0x1]  ;;  %v1771_v51 = vsel %vm1733_vm1, %v1770_v18, 0.0  ;;  %v1794_v11 = vmul.f32 %v1793_v36, %v1791_v47 }
 0x44b   :  { %v1747_v60 = vsel %vm1733_vm1, %v1746_v55, 0.0  ;;  %v1782_v9 = vmul.f32 %v1781_v61, %v1779_v1  ;;  %v1817_v15 = vld [vmem:[%s1816_s4] sm:$0x1] }
 0x44c   :  { %v1805_v5 = vld [vmem:[%s1804_s18] sm:$0x1]  ;;  %v1795_v20 = vsel %vm1733_vm1, %v1794_v11, 0.0  ;;  %v1818_v38 = vmul.f32 %v1817_v15, %v1815_v19 }
 0x44d   :  { %1772 = vadd.xlane.f32.xlu1 %v1771_v51  ;;  %v1783_v63 = vsel %vm1733_vm1, %v1782_v9, 0.0  ;;  %v1806_v28 = vmul.f32 %v1805_v5, %v1803_v26 }
 0x44e   :  { %1748 = vadd.xlane.f32.xlu0 %v1747_v60  ;;  %v1819_v22 = vsel %vm1733_vm1, %v1818_v38, 0.0 }
 0x44f   :  { %v1807_v52 = vsel %vm1733_vm1, %v1806_v28, 0.0 }
 0x451   :  { %1796 = vadd.xlane.f32.xlu1 %v1795_v20 }
 0x452   :  { %1784 = vadd.xlane.f32.xlu0 %v1783_v63 }
 0x455   :  { %1820 = vadd.xlane.f32.xlu1 %v1819_v22 }
 0x456   :  { %1808 = vadd.xlane.f32.xlu0 %v1807_v52 }
 0x4d6   :  { %v1761_v31 = vpop.xlane.xlu1 %1760 }
 0x4d7   :  { %v1736_v35 = vpop.xlane.xlu0 %1735  ;;  %v1762_v23 = vmul.f32 0.0625, %v1761_v31 }
 0x4d8   :  { %v1737_v24 = vmul.f32 0.0625, %v1736_v35 }
 0x4d9   :  { %1763 = vst.msk [vmem:[%s2880_s5 + $0x2] sm:$0x1] %vm1738_vm2, %v1762_v23 }
 0x4da   :  { %1739 = vst.msk [vmem:[%s2880_s5] sm:$0x1] %vm1738_vm2, %v1737_v24  ;;  %v1773_v39 = vpop.xlane.xlu1 %1772 }
 0x4db   :  { %v1749_v21 = vpop.xlane.xlu0 %1748  ;;  %v1774_v25 = vmul.f32 0.0625, %v1773_v39 }
 0x4dc   :  { %v1750_v56 = vmul.f32 0.0625, %v1749_v21 }
 0x4dd   :  { %1775 = vst.msk [vmem:[%s2880_s5 + $0x3] sm:$0x1] %vm1738_vm2, %v1774_v25 }
 0x4de   :  { %1751 = vst.msk [vmem:[%s2880_s5 + $0x1] sm:$0x1] %vm1738_vm2, %v1750_v56  ;;  %v1797_v8 = vpop.xlane.xlu1 %1796 }
 0x4df   :  { %v1785_v45 = vpop.xlane.xlu0 %1784  ;;  %v1798_v49 = vmul.f32 0.0625, %v1797_v8 }
 0x4e0   :  { %v1786_v43 = vmul.f32 0.0625, %v1785_v45 }
 0x4e1   :  { %1799 = vst.msk [vmem:[%s2880_s5 + $0x5] sm:$0x1] %vm1738_vm2, %v1798_v49 }
 0x4e2   :  { %1787 = vst.msk [vmem:[%s2880_s5 + $0x4] sm:$0x1] %vm1738_vm2, %v1786_v43  ;;  %v1821_v57 = vpop.xlane.xlu1 %1820 }
 0x4e3   :  { %v1809_v29 = vpop.xlane.xlu0 %1808  ;;  %v1822_v30 = vmul.f32 0.0625, %v1821_v57 }
 0x4e4   :  { %v1810_v32 = vmul.f32 0.0625, %v1809_v29 }
 0x4e5   :  { %1823 = vst.msk [vmem:[%s2880_s5 + $0x7] sm:$0x1] %vm1738_vm2, %v1822_v30 }
 0x4e6   :  { %1811 = vst.msk [vmem:[%s2880_s5 + $0x6] sm:$0x1] %vm1738_vm2, %v1810_v32 }
 0x4e7   :  { %1828 = vsyncpa [#allocation7], 1 }
 0x4e8   :  { %1829 = vsyncpa [#allocation13], 1 }
 0x4e9   :  { %1830 = vsyncpa [#allocation8], 1 }
 0x4ea   :  { %1831 = vsyncpa [#allocation9], 1 }

</bundles_post_ra>
